<compile_context>
chip_gen: v6e
topology: v6e:2x2x1
jax: 0.10.0
libtpu: 0.0.40
codegen_flags: <defaults>
</compile_context>

<pallas_src>
import functools

import jax
import jax.numpy as jnp
import numpy as np
from jax.experimental import pallas as pl
from jax.experimental.pallas import tpu as pltpu


def mpnn_fused_kernel(nodes_ref, edges_ref, adj_ref,
                      w1t_ref, b1_ref,
                      w2abt_ref, w2ct_ref, b2_ref,
                      wiht_ref, bih_ref, whht_ref, bhh_ref,
                      wlt_ref, bl_ref,
                      out_ref, *, n_head, Fv, H):
    f32 = jnp.float32
    bf16 = jnp.bfloat16

    x = nodes_ref[0]                                   # (V, Fv) f32
    x_bf = x.astype(bf16)

    # ---- per-batch-element invariants (once per grid step) -------------------
    mask_f = (adj_ref[0] != 0.0).astype(f32)           # (V, V)
    mask_bf = mask_f.astype(bf16)
    deg = jnp.sum(mask_f, axis=1, keepdims=True)       # (V, 1)
    # masked neighbor-sum of edge features, f32 accumulate, stored bf16.
    # (At production V/Fe this masked sum could be hoisted to a tiny pre-pass
    #  so the edges block never enters this kernel's VMEM.)
    esum_bf = jnp.sum(edges_ref[0].astype(f32) * mask_f[:, :, None],
                      axis=1).astype(bf16)             # (V, Fe)

    relu_upds = []
    for h in range(n_head):        # static unroll; weights stay VMEM-resident
        # ---- linear1 ---------------------------------------------------------
        hv = (jnp.dot(x_bf, w1t_ref[h], preferred_element_type=f32)
              + b1_ref[h])                             # (V, Fv)

        # ---- pair message, algebraically reduced -----------------------------
        ab = jnp.dot(hv.astype(bf16), w2abt_ref[h],
                     preferred_element_type=f32)       # (V, 2H)
        a_v = ab[:, :H]
        b_w = ab[:, H:]
        nbr = jnp.dot(mask_bf, b_w.astype(bf16),
                      preferred_element_type=f32)      # (V, H)
        e_t = jnp.dot(esum_bf, w2ct_ref[h],
                      preferred_element_type=f32)      # (V, H)
        msg = jnp.maximum(deg * (a_v + b2_ref[h]) + nbr + e_t, 0.0)
        msg_bf = msg.astype(bf16)

        # ---- GRUCell(input=msg, hidden=x), fused gates -----------------------
        gi = (jnp.dot(msg_bf, wiht_ref[h], preferred_element_type=f32)
              + bih_ref[h])                            # (V, 3*Fv)
        gh = (jnp.dot(x_bf, whht_ref[h], preferred_element_type=f32)
              + bhh_ref[h])                            # (V, 3*Fv)
        r = jax.nn.sigmoid(gi[:, :Fv] + gh[:, :Fv])
        z = jax.nn.sigmoid(gi[:, Fv:2 * Fv] + gh[:, Fv:2 * Fv])
        n = jnp.tanh(gi[:, 2 * Fv:] + r * gh[:, 2 * Fv:])
        upd = (1.0 - z) * n + z * x                    # (V, Fv)
        relu_upds.append(jnp.maximum(upd, 0.0))

    # ---- head mixing: one big-K GEMM + residual + bias ------------------------
    cat = jnp.concatenate(relu_upds, axis=-1)          # (V, n_head*Fv)
    out_ref[0] = (x + bl_ref[...]
                  + jnp.dot(cat.astype(bf16), wlt_ref[...],
                            preferred_element_type=f32))


def prepare_params(p):
    """Host-side weight prep: transpose, fuse gates, bf16 casts."""
    n_head, Fv, _ = p["w1"].shape
    bf = jnp.bfloat16
    t = lambda a: jnp.transpose(a, (0, 2, 1))
    w2 = p["w2"]
    return dict(
        w1t=t(p["w1"]).astype(bf),                     # (n_head, Fv, Fv)
        b1=p["b1"],                                    # (n_head, 1, Fv)
        # [W2a.T | W2b.T] fused -> one (Fv, 2H) matmul per head
        w2abt=jnp.concatenate([t(w2[:, :, :Fv]), t(w2[:, :, Fv:2 * Fv])],
                              axis=-1).astype(bf),     # (n_head, Fv, 2H)
        w2ct=t(w2[:, :, 2 * Fv:]).astype(bf),          # (n_head, Fe, H)
        b2=p["b2"],                                    # (n_head, 1, H)
        wiht=t(p["wih"]).astype(bf),                   # (n_head, H, 3Fv) fused gates
        bih=p["bih"],                                  # (n_head, 1, 3Fv)
        whht=t(p["whh"]).astype(bf),                   # (n_head, Fv, 3Fv) fused gates
        bhh=p["bhh"],                                  # (n_head, 1, 3Fv)
        wlt=jnp.transpose(p["wl"]).astype(bf),         # (n_head*Fv, Fv)
        bl=p["bl"],                                    # (1, Fv)
    )


def mpnn_layer(nodes, edges, adj, p):
    B, V, Fv = nodes.shape
    Fe = edges.shape[-1]
    n_head = p["w1"].shape[0]
    H = p["w2"].shape[1]
    w = prepare_params(p)
    # edges only feed the bf16 masked neighbor sum -> ship them as bf16.
    edges_bf = edges.astype(jnp.bfloat16)

    weight_order = ("w1t", "b1", "w2abt", "w2ct", "b2",
                    "wiht", "bih", "whht", "bhh", "wlt", "bl")

    def resident(name):
        a = w[name]
        zeros = (0,) * a.ndim
        # full-array block + constant index -> loaded once, VMEM-resident.
        return pl.BlockSpec(a.shape, lambda b, z=zeros: z)

    in_specs = [
        pl.BlockSpec((1, V, Fv), lambda b: (b, 0, 0)),           # nodes
        pl.BlockSpec((1, V, V, Fe), lambda b: (b, 0, 0, 0)),     # edges (bf16)
        pl.BlockSpec((1, V, V), lambda b: (b, 0, 0)),            # adj
    ] + [resident(k) for k in weight_order]

    # rough advisory cost estimate for the XLA scheduler
    flops = int(B * (2 * V * V * Fe
                     + n_head * 2 * V * (Fv * Fv + Fv * 2 * H + V * H + Fe * H
                                         + H * 3 * Fv + Fv * 3 * Fv)
                     + 2 * V * n_head * Fv * Fv))
    transcend = int(B * n_head * 3 * V * Fv)
    weight_bytes = int(sum(int(w[k].size) * w[k].dtype.itemsize
                           for k in weight_order))
    bytes_accessed = int(4 * (2 * nodes.size + adj.size)
                         + 2 * edges_bf.size + weight_bytes)

    # explicit VMEM budget: double-buffered per-b blocks + resident weights +
    # transient temps, with headroom; clamped to the v7x physical budget.
    blk_bytes = 2 * (V * Fv * 4 + V * V * Fe * 2 + V * V * 4 + V * Fv * 4)
    vmem_need = blk_bytes + 2 * weight_bytes + V * V * Fe * 4 + (2 << 20)
    vmem_limit = int(min(max(vmem_need, 4 << 20), 64 << 20))

    kernel = functools.partial(mpnn_fused_kernel, n_head=n_head, Fv=Fv, H=H)

    out = pl.pallas_call(
        kernel,
        out_shape=jax.ShapeDtypeStruct((B, V, Fv), jnp.float32),
        grid_spec=pltpu.PrefetchScalarGridSpec(
            num_scalar_prefetch=0,
            grid=(B,),
            in_specs=in_specs,
            out_specs=pl.BlockSpec((1, V, Fv), lambda b: (b, 0, 0))),
        compiler_params=pltpu.CompilerParams(
            dimension_semantics=("parallel",),
            vmem_limit_bytes=vmem_limit),
        cost_estimate=pl.CostEstimate(flops=flops, transcendentals=transcend,
                                      bytes_accessed=bytes_accessed),
    )(nodes, edges_bf, adj, *[w[k] for k in weight_order])
    return out


def mpnn_ref(nodes, edges, adj, p):
    """Pure-JAX f32 reference mirroring the PyTorch forward (dropout = identity)."""
    B, V, Fv = nodes.shape
    n_head = p["w1"].shape[0]
    outs = []
    for h in range(n_head):
        hv = nodes @ p["w1"][h].T + p["b1"][h, 0]
        hv_e = jnp.broadcast_to(hv[:, :, None, :], (B, V, V, Fv))
        hw_e = jnp.transpose(hv_e, (0, 2, 1, 3))
        cat = jnp.concatenate([hv_e, hw_e, edges], axis=-1)
        msg = cat @ p["w2"][h].T + p["b2"][h, 0]
        msg = jnp.where((adj != 0)[..., None], msg, 0.0)
        msg = jax.nn.relu(jnp.sum(msg, axis=2))
        gi = msg @ p["wih"][h].T + p["bih"][h, 0]
        gh = nodes @ p["whh"][h].T + p["bhh"][h, 0]
        r = jax.nn.sigmoid(gi[..., :Fv] + gh[..., :Fv])
        z = jax.nn.sigmoid(gi[..., Fv:2 * Fv] + gh[..., Fv:2 * Fv])
        n = jnp.tanh(gi[..., 2 * Fv:] + r * gh[..., 2 * Fv:])
        outs.append((1.0 - z) * n + z * nodes)
    cat = jnp.concatenate(outs, axis=-1)
    return nodes + jax.nn.relu(cat) @ p["wl"].T + p["bl"][0]


def init_params(key, node_size, edge_size, hidden_size, n_head):
    Fv, Fe, H = node_size, edge_size, hidden_size
    ks = jax.random.split(key, 10)

    def u(k, shape, fan_in):
        bound = 1.0 / np.sqrt(fan_in)
        return jax.random.uniform(k, shape, jnp.float32, -bound, bound)

    return dict(
        w1=u(ks[0], (n_head, Fv, Fv), Fv),
        b1=u(ks[1], (n_head, 1, Fv), Fv),
        w2=u(ks[2], (n_head, H, 2 * Fv + Fe), 2 * Fv + Fe),
        b2=u(ks[3], (n_head, 1, H), 2 * Fv + Fe),
        wih=u(ks[4], (n_head, 3 * Fv, H), Fv),     # GRUCell: bound = 1/sqrt(hidden)
        whh=u(ks[5], (n_head, 3 * Fv, Fv), Fv),
        bih=u(ks[6], (n_head, 1, 3 * Fv), Fv),
        bhh=u(ks[7], (n_head, 1, 3 * Fv), Fv),
        wl=u(ks[8], (Fv, n_head * Fv), n_head * Fv),
        bl=u(ks[9], (1, Fv), n_head * Fv),
    )


if __name__ == "__main__":
    B, V, Fv, Fe, H, n_head = 2, 8, 16, 8, 32, 2

    key = jax.random.PRNGKey(0)
    k_nodes, k_edges, k_adj, k_params = jax.random.split(key, 4)

    nodes = jax.random.normal(k_nodes, (B, V, Fv), jnp.float32)
    edges = jax.random.normal(k_edges, (B, V, V, Fe), jnp.float32)
    adj = jax.random.bernoulli(k_adj, 0.5, (B, V, V)).astype(jnp.float32)
    params = init_params(k_params, Fv, Fe, H, n_head)

    out = jax.block_until_ready(mpnn_layer(nodes, edges, adj, params))
    ref = jax.block_until_ready(mpnn_ref(nodes, edges, adj, params))

    # All kernel matmuls use bf16 operands (f32 accumulation) vs. the pure-f32
    # reference -> bf16-appropriate tolerance.
    np.testing.assert_allclose(np.asarray(out), np.asarray(ref), rtol=3e-2, atol=3e-2)
    print("KERNEL_OK")
</pallas_src>

<mosaic_0001>
module attributes {stable_mosaic.version = 11 : i64} {
  func.func @mpnn_fused_kernel(%arg0: i32, %arg1: memref<1x8x16xf32, #tpu.memory_space<vmem>>, %arg2: memref<1x8x8x8xbf16, #tpu.memory_space<vmem>>, %arg3: memref<1x8x8xf32, #tpu.memory_space<vmem>>, %arg4: memref<2x16x16xbf16, #tpu.memory_space<vmem>>, %arg5: memref<2x1x16xf32, #tpu.memory_space<vmem>>, %arg6: memref<2x16x64xbf16, #tpu.memory_space<vmem>>, %arg7: memref<2x8x32xbf16, #tpu.memory_space<vmem>>, %arg8: memref<2x1x32xf32, #tpu.memory_space<vmem>>, %arg9: memref<2x32x48xbf16, #tpu.memory_space<vmem>>, %arg10: memref<2x1x48xf32, #tpu.memory_space<vmem>>, %arg11: memref<2x16x48xbf16, #tpu.memory_space<vmem>>, %arg12: memref<2x1x48xf32, #tpu.memory_space<vmem>>, %arg13: memref<32x16xbf16, #tpu.memory_space<vmem>>, %arg14: memref<1x16xf32, #tpu.memory_space<vmem>>, %arg15: memref<1x8x16xf32, #tpu.memory_space<vmem>>) attributes {dimension_semantics = [#tpu.dimension_semantics<parallel>], iteration_bounds = array<i64: 2>, scalar_prefetch = 0 : i64, scratch_operands = 0 : i64, tpu.core_type = #tpu.core_type<tc>, window_params = [{transform_indices = @transform_0, window_bounds = array<i64: 1, 8, 16>}, {transform_indices = @transform_1, window_bounds = array<i64: 1, 8, 8, 8>}, {transform_indices = @transform_2, window_bounds = array<i64: 1, 8, 8>}, {pipeline_mode = #tpu.pipeline_mode<synchronous>, transform_indices = @transform_3, window_bounds = array<i64: 2, 16, 16>}, {pipeline_mode = #tpu.pipeline_mode<synchronous>, transform_indices = @transform_4, window_bounds = array<i64: 2, 1, 16>}, {pipeline_mode = #tpu.pipeline_mode<synchronous>, transform_indices = @transform_5, window_bounds = array<i64: 2, 16, 64>}, {pipeline_mode = #tpu.pipeline_mode<synchronous>, transform_indices = @transform_6, window_bounds = array<i64: 2, 8, 32>}, {pipeline_mode = #tpu.pipeline_mode<synchronous>, transform_indices = @transform_7, window_bounds = array<i64: 2, 1, 32>}, {pipeline_mode = #tpu.pipeline_mode<synchronous>, transform_indices = @transform_8, window_bounds = array<i64: 2, 32, 48>}, {pipeline_mode = #tpu.pipeline_mode<synchronous>, transform_indices = @transform_9, window_bounds = array<i64: 2, 1, 48>}, {pipeline_mode = #tpu.pipeline_mode<synchronous>, transform_indices = @transform_10, window_bounds = array<i64: 2, 16, 48>}, {pipeline_mode = #tpu.pipeline_mode<synchronous>, transform_indices = @transform_11, window_bounds = array<i64: 2, 1, 48>}, {pipeline_mode = #tpu.pipeline_mode<synchronous>, transform_indices = @transform_12, window_bounds = array<i64: 32, 16>}, {pipeline_mode = #tpu.pipeline_mode<synchronous>, transform_indices = @transform_13, window_bounds = array<i64: 1, 16>}, {transform_indices = @transform_14, window_bounds = array<i64: 1, 8, 16>}]} {
    %c0 = arith.constant 0 : index
    %c0_0 = arith.constant 0 : index
    %c0_1 = arith.constant 0 : index
    %0 = vector.load %arg1[%c0, %c0_0, %c0_1] : memref<1x8x16xf32, #tpu.memory_space<vmem>>, vector<1x8x16xf32>
    %1 = vector.shape_cast %0 : vector<1x8x16xf32> to vector<8x16xf32>
    %2 = arith.truncf %1 : vector<8x16xf32> to vector<8x16xbf16>
    %c0_2 = arith.constant 0 : index
    %c0_3 = arith.constant 0 : index
    %c0_4 = arith.constant 0 : index
    %3 = vector.load %arg3[%c0_2, %c0_3, %c0_4] : memref<1x8x8xf32, #tpu.memory_space<vmem>>, vector<1x8x8xf32>
    %4 = vector.shape_cast %3 : vector<1x8x8xf32> to vector<8x8xf32>
    %cst = arith.constant 0.000000e+00 : f32
    %5 = vector.broadcast %cst : f32 to vector<8x8xf32>
    %6 = arith.cmpf one, %4, %5 : vector<8x8xf32>
    %7 = arith.extui %6 : vector<8x8xi1> to vector<8x8xi32>
    %8 = arith.sitofp %7 : vector<8x8xi32> to vector<8x8xf32>
    %9 = arith.truncf %8 : vector<8x8xf32> to vector<8x8xbf16>
    %cst_5 = arith.constant dense<0.000000e+00> : vector<8xf32>
    %10 = vector.multi_reduction <add>, %8, %cst_5 [1] : vector<8x8xf32> to vector<8xf32>
    %11 = vector.shape_cast %10 : vector<8xf32> to vector<8x1xf32>
    %c0_6 = arith.constant 0 : index
    %c0_7 = arith.constant 0 : index
    %c0_8 = arith.constant 0 : index
    %c0_9 = arith.constant 0 : index
    %12 = vector.load %arg2[%c0_6, %c0_7, %c0_8, %c0_9] : memref<1x8x8x8xbf16, #tpu.memory_space<vmem>>, vector<1x8x8x8xbf16>
    %13 = vector.shape_cast %12 : vector<1x8x8x8xbf16> to vector<8x8x8xbf16>
    %14 = arith.extf %13 : vector<8x8x8xbf16> to vector<8x8x8xf32>
    %15 = vector.shape_cast %8 : vector<8x8xf32> to vector<8x8x1xf32>
    %16 = vector.broadcast %15 : vector<8x8x1xf32> to vector<8x8x8xf32>
    %17 = arith.mulf %14, %16 : vector<8x8x8xf32>
    %cst_10 = arith.constant dense<0.000000e+00> : vector<8x8xf32>
    %18 = vector.multi_reduction <add>, %17, %cst_10 [1] : vector<8x8x8xf32> to vector<8x8xf32>
    %19 = arith.truncf %18 : vector<8x8xf32> to vector<8x8xbf16>
    %c0_11 = arith.constant 0 : index
    %c0_12 = arith.constant 0 : index
    %c0_13 = arith.constant 0 : index
    %20 = vector.load %arg4[%c0_11, %c0_12, %c0_13] : memref<2x16x16xbf16, #tpu.memory_space<vmem>>, vector<1x16x16xbf16>
    %21 = vector.shape_cast %20 : vector<1x16x16xbf16> to vector<16x16xbf16>
    %cst_14 = arith.constant dense<0.000000e+00> : vector<8x16xf32>
    %22 = tpu.matmul %2, %21, %cst_14 {dimension_numbers = #tpu.dot_dimension_numbers<[1], [0], [0], [1], [0, 0, 1, 1], [], []>} : vector<8x16xbf16>, vector<16x16xbf16>, vector<8x16xf32> -> vector<8x16xf32>
    %c0_15 = arith.constant 0 : index
    %c0_16 = arith.constant 0 : index
    %c0_17 = arith.constant 0 : index
    %23 = vector.load %arg5[%c0_15, %c0_16, %c0_17] : memref<2x1x16xf32, #tpu.memory_space<vmem>>, vector<1x1x16xf32>
    %24 = vector.shape_cast %23 : vector<1x1x16xf32> to vector<1x16xf32>
    %25 = vector.broadcast %24 : vector<1x16xf32> to vector<8x16xf32>
    %26 = arith.addf %22, %25 : vector<8x16xf32>
    %27 = arith.truncf %26 : vector<8x16xf32> to vector<8x16xbf16>
    %c0_18 = arith.constant 0 : index
    %c0_19 = arith.constant 0 : index
    %c0_20 = arith.constant 0 : index
    %28 = vector.load %arg6[%c0_18, %c0_19, %c0_20] : memref<2x16x64xbf16, #tpu.memory_space<vmem>>, vector<1x16x64xbf16>
    %29 = vector.shape_cast %28 : vector<1x16x64xbf16> to vector<16x64xbf16>
    %cst_21 = arith.constant dense<0.000000e+00> : vector<8x64xf32>
    %30 = tpu.matmul %27, %29, %cst_21 {dimension_numbers = #tpu.dot_dimension_numbers<[1], [0], [0], [1], [0, 0, 1, 1], [], []>} : vector<8x16xbf16>, vector<16x64xbf16>, vector<8x64xf32> -> vector<8x64xf32>
    %31 = vector.extract_strided_slice %30 {offsets = [0, 0], sizes = [8, 32], strides = [1, 1]} : vector<8x64xf32> to vector<8x32xf32>
    %32 = vector.extract_strided_slice %30 {offsets = [0, 32], sizes = [8, 32], strides = [1, 1]} : vector<8x64xf32> to vector<8x32xf32>
    %33 = arith.truncf %32 : vector<8x32xf32> to vector<8x32xbf16>
    %cst_22 = arith.constant dense<0.000000e+00> : vector<8x32xf32>
    %34 = tpu.matmul %9, %33, %cst_22 {dimension_numbers = #tpu.dot_dimension_numbers<[1], [0], [0], [1], [0, 0, 1, 1], [], []>} : vector<8x8xbf16>, vector<8x32xbf16>, vector<8x32xf32> -> vector<8x32xf32>
    %c0_23 = arith.constant 0 : index
    %c0_24 = arith.constant 0 : index
    %c0_25 = arith.constant 0 : index
    %35 = vector.load %arg7[%c0_23, %c0_24, %c0_25] : memref<2x8x32xbf16, #tpu.memory_space<vmem>>, vector<1x8x32xbf16>
    %36 = vector.shape_cast %35 : vector<1x8x32xbf16> to vector<8x32xbf16>
    %cst_26 = arith.constant dense<0.000000e+00> : vector<8x32xf32>
    %37 = tpu.matmul %19, %36, %cst_26 {dimension_numbers = #tpu.dot_dimension_numbers<[1], [0], [0], [1], [0, 0, 1, 1], [], []>} : vector<8x8xbf16>, vector<8x32xbf16>, vector<8x32xf32> -> vector<8x32xf32>
    %c0_27 = arith.constant 0 : index
    %c0_28 = arith.constant 0 : index
    %c0_29 = arith.constant 0 : index
    %38 = vector.load %arg8[%c0_27, %c0_28, %c0_29] : memref<2x1x32xf32, #tpu.memory_space<vmem>>, vector<1x1x32xf32>
    %39 = vector.shape_cast %38 : vector<1x1x32xf32> to vector<1x32xf32>
    %40 = vector.broadcast %39 : vector<1x32xf32> to vector<8x32xf32>
    %41 = arith.addf %31, %40 : vector<8x32xf32>
    %42 = vector.broadcast %11 : vector<8x1xf32> to vector<8x32xf32>
    %43 = arith.mulf %42, %41 : vector<8x32xf32>
    %44 = arith.addf %43, %34 : vector<8x32xf32>
    %45 = arith.addf %44, %37 : vector<8x32xf32>
    %cst_30 = arith.constant 0.000000e+00 : f32
    %46 = vector.broadcast %cst_30 : f32 to vector<8x32xf32>
    %47 = arith.maximumf %45, %46 : vector<8x32xf32>
    %48 = arith.truncf %47 : vector<8x32xf32> to vector<8x32xbf16>
    %c0_31 = arith.constant 0 : index
    %c0_32 = arith.constant 0 : index
    %c0_33 = arith.constant 0 : index
    %49 = vector.load %arg9[%c0_31, %c0_32, %c0_33] : memref<2x32x48xbf16, #tpu.memory_space<vmem>>, vector<1x32x48xbf16>
    %50 = vector.shape_cast %49 : vector<1x32x48xbf16> to vector<32x48xbf16>
    %cst_34 = arith.constant dense<0.000000e+00> : vector<8x48xf32>
    %51 = tpu.matmul %48, %50, %cst_34 {dimension_numbers = #tpu.dot_dimension_numbers<[1], [0], [0], [1], [0, 0, 1, 1], [], []>} : vector<8x32xbf16>, vector<32x48xbf16>, vector<8x48xf32> -> vector<8x48xf32>
    %c0_35 = arith.constant 0 : index
    %c0_36 = arith.constant 0 : index
    %c0_37 = arith.constant 0 : index
    %52 = vector.load %arg10[%c0_35, %c0_36, %c0_37] : memref<2x1x48xf32, #tpu.memory_space<vmem>>, vector<1x1x48xf32>
    %53 = vector.shape_cast %52 : vector<1x1x48xf32> to vector<1x48xf32>
    %54 = vector.broadcast %53 : vector<1x48xf32> to vector<8x48xf32>
    %55 = arith.addf %51, %54 : vector<8x48xf32>
    %c0_38 = arith.constant 0 : index
    %c0_39 = arith.constant 0 : index
    %c0_40 = arith.constant 0 : index
    %56 = vector.load %arg11[%c0_38, %c0_39, %c0_40] : memref<2x16x48xbf16, #tpu.memory_space<vmem>>, vector<1x16x48xbf16>
    %57 = vector.shape_cast %56 : vector<1x16x48xbf16> to vector<16x48xbf16>
    %cst_41 = arith.constant dense<0.000000e+00> : vector<8x48xf32>
    %58 = tpu.matmul %2, %57, %cst_41 {dimension_numbers = #tpu.dot_dimension_numbers<[1], [0], [0], [1], [0, 0, 1, 1], [], []>} : vector<8x16xbf16>, vector<16x48xbf16>, vector<8x48xf32> -> vector<8x48xf32>
    %c0_42 = arith.constant 0 : index
    %c0_43 = arith.constant 0 : index
    %c0_44 = arith.constant 0 : index
    %59 = vector.load %arg12[%c0_42, %c0_43, %c0_44] : memref<2x1x48xf32, #tpu.memory_space<vmem>>, vector<1x1x48xf32>
    %60 = vector.shape_cast %59 : vector<1x1x48xf32> to vector<1x48xf32>
    %61 = vector.broadcast %60 : vector<1x48xf32> to vector<8x48xf32>
    %62 = arith.addf %58, %61 : vector<8x48xf32>
    %63 = vector.extract_strided_slice %55 {offsets = [0, 0], sizes = [8, 16], strides = [1, 1]} : vector<8x48xf32> to vector<8x16xf32>
    %64 = vector.extract_strided_slice %62 {offsets = [0, 0], sizes = [8, 16], strides = [1, 1]} : vector<8x48xf32> to vector<8x16xf32>
    %65 = arith.addf %63, %64 : vector<8x16xf32>
    %66 = arith.negf %65 : vector<8x16xf32>
    %67 = math.exp %66 : vector<8x16xf32>
    %cst_45 = arith.constant 1.000000e+00 : f32
    %68 = vector.broadcast %cst_45 : f32 to vector<8x16xf32>
    %69 = arith.addf %68, %67 : vector<8x16xf32>
    %70 = arith.divf %68, %69 : vector<8x16xf32>
    %71 = vector.extract_strided_slice %55 {offsets = [0, 16], sizes = [8, 16], strides = [1, 1]} : vector<8x48xf32> to vector<8x16xf32>
    %72 = vector.extract_strided_slice %62 {offsets = [0, 16], sizes = [8, 16], strides = [1, 1]} : vector<8x48xf32> to vector<8x16xf32>
    %73 = arith.addf %71, %72 : vector<8x16xf32>
    %74 = arith.negf %73 : vector<8x16xf32>
    %75 = math.exp %74 : vector<8x16xf32>
    %cst_46 = arith.constant 1.000000e+00 : f32
    %76 = vector.broadcast %cst_46 : f32 to vector<8x16xf32>
    %77 = arith.addf %76, %75 : vector<8x16xf32>
    %78 = arith.divf %76, %77 : vector<8x16xf32>
    %79 = vector.extract_strided_slice %55 {offsets = [0, 32], sizes = [8, 16], strides = [1, 1]} : vector<8x48xf32> to vector<8x16xf32>
    %80 = vector.extract_strided_slice %62 {offsets = [0, 32], sizes = [8, 16], strides = [1, 1]} : vector<8x48xf32> to vector<8x16xf32>
    %81 = arith.mulf %70, %80 : vector<8x16xf32>
    %82 = arith.addf %79, %81 : vector<8x16xf32>
    %83 = math.tanh %82 : vector<8x16xf32>
    %cst_47 = arith.constant 1.000000e+00 : f32
    %84 = vector.broadcast %cst_47 : f32 to vector<8x16xf32>
    %85 = arith.subf %84, %78 : vector<8x16xf32>
    %86 = arith.mulf %85, %83 : vector<8x16xf32>
    %87 = arith.mulf %78, %1 : vector<8x16xf32>
    %88 = arith.addf %86, %87 : vector<8x16xf32>
    %cst_48 = arith.constant 0.000000e+00 : f32
    %89 = vector.broadcast %cst_48 : f32 to vector<8x16xf32>
    %90 = arith.maximumf %88, %89 : vector<8x16xf32>
    %c1 = arith.constant 1 : index
    %c0_49 = arith.constant 0 : index
    %c0_50 = arith.constant 0 : index
    %91 = vector.load %arg4[%c1, %c0_49, %c0_50] : memref<2x16x16xbf16, #tpu.memory_space<vmem>>, vector<1x16x16xbf16>
    %92 = vector.shape_cast %91 : vector<1x16x16xbf16> to vector<16x16xbf16>
    %cst_51 = arith.constant dense<0.000000e+00> : vector<8x16xf32>
    %93 = tpu.matmul %2, %92, %cst_51 {dimension_numbers = #tpu.dot_dimension_numbers<[1], [0], [0], [1], [0, 0, 1, 1], [], []>} : vector<8x16xbf16>, vector<16x16xbf16>, vector<8x16xf32> -> vector<8x16xf32>
    %c1_52 = arith.constant 1 : index
    %c0_53 = arith.constant 0 : index
    %c0_54 = arith.constant 0 : index
    %94 = vector.load %arg5[%c1_52, %c0_53, %c0_54] : memref<2x1x16xf32, #tpu.memory_space<vmem>>, vector<1x1x16xf32>
    %95 = vector.shape_cast %94 : vector<1x1x16xf32> to vector<1x16xf32>
    %96 = vector.broadcast %95 : vector<1x16xf32> to vector<8x16xf32>
    %97 = arith.addf %93, %96 : vector<8x16xf32>
    %98 = arith.truncf %97 : vector<8x16xf32> to vector<8x16xbf16>
    %c1_55 = arith.constant 1 : index
    %c0_56 = arith.constant 0 : index
    %c0_57 = arith.constant 0 : index
    %99 = vector.load %arg6[%c1_55, %c0_56, %c0_57] : memref<2x16x64xbf16, #tpu.memory_space<vmem>>, vector<1x16x64xbf16>
    %100 = vector.shape_cast %99 : vector<1x16x64xbf16> to vector<16x64xbf16>
    %cst_58 = arith.constant dense<0.000000e+00> : vector<8x64xf32>
    %101 = tpu.matmul %98, %100, %cst_58 {dimension_numbers = #tpu.dot_dimension_numbers<[1], [0], [0], [1], [0, 0, 1, 1], [], []>} : vector<8x16xbf16>, vector<16x64xbf16>, vector<8x64xf32> -> vector<8x64xf32>
    %102 = vector.extract_strided_slice %101 {offsets = [0, 0], sizes = [8, 32], strides = [1, 1]} : vector<8x64xf32> to vector<8x32xf32>
    %103 = vector.extract_strided_slice %101 {offsets = [0, 32], sizes = [8, 32], strides = [1, 1]} : vector<8x64xf32> to vector<8x32xf32>
    %104 = arith.truncf %103 : vector<8x32xf32> to vector<8x32xbf16>
    %cst_59 = arith.constant dense<0.000000e+00> : vector<8x32xf32>
    %105 = tpu.matmul %9, %104, %cst_59 {dimension_numbers = #tpu.dot_dimension_numbers<[1], [0], [0], [1], [0, 0, 1, 1], [], []>} : vector<8x8xbf16>, vector<8x32xbf16>, vector<8x32xf32> -> vector<8x32xf32>
    %c1_60 = arith.constant 1 : index
    %c0_61 = arith.constant 0 : index
    %c0_62 = arith.constant 0 : index
    %106 = vector.load %arg7[%c1_60, %c0_61, %c0_62] : memref<2x8x32xbf16, #tpu.memory_space<vmem>>, vector<1x8x32xbf16>
    %107 = vector.shape_cast %106 : vector<1x8x32xbf16> to vector<8x32xbf16>
    %cst_63 = arith.constant dense<0.000000e+00> : vector<8x32xf32>
    %108 = tpu.matmul %19, %107, %cst_63 {dimension_numbers = #tpu.dot_dimension_numbers<[1], [0], [0], [1], [0, 0, 1, 1], [], []>} : vector<8x8xbf16>, vector<8x32xbf16>, vector<8x32xf32> -> vector<8x32xf32>
    %c1_64 = arith.constant 1 : index
    %c0_65 = arith.constant 0 : index
    %c0_66 = arith.constant 0 : index
    %109 = vector.load %arg8[%c1_64, %c0_65, %c0_66] : memref<2x1x32xf32, #tpu.memory_space<vmem>>, vector<1x1x32xf32>
    %110 = vector.shape_cast %109 : vector<1x1x32xf32> to vector<1x32xf32>
    %111 = vector.broadcast %110 : vector<1x32xf32> to vector<8x32xf32>
    %112 = arith.addf %102, %111 : vector<8x32xf32>
    %113 = vector.broadcast %11 : vector<8x1xf32> to vector<8x32xf32>
    %114 = arith.mulf %113, %112 : vector<8x32xf32>
    %115 = arith.addf %114, %105 : vector<8x32xf32>
    %116 = arith.addf %115, %108 : vector<8x32xf32>
    %cst_67 = arith.constant 0.000000e+00 : f32
    %117 = vector.broadcast %cst_67 : f32 to vector<8x32xf32>
    %118 = arith.maximumf %116, %117 : vector<8x32xf32>
    %119 = arith.truncf %118 : vector<8x32xf32> to vector<8x32xbf16>
    %c1_68 = arith.constant 1 : index
    %c0_69 = arith.constant 0 : index
    %c0_70 = arith.constant 0 : index
    %120 = vector.load %arg9[%c1_68, %c0_69, %c0_70] : memref<2x32x48xbf16, #tpu.memory_space<vmem>>, vector<1x32x48xbf16>
    %121 = vector.shape_cast %120 : vector<1x32x48xbf16> to vector<32x48xbf16>
    %cst_71 = arith.constant dense<0.000000e+00> : vector<8x48xf32>
    %122 = tpu.matmul %119, %121, %cst_71 {dimension_numbers = #tpu.dot_dimension_numbers<[1], [0], [0], [1], [0, 0, 1, 1], [], []>} : vector<8x32xbf16>, vector<32x48xbf16>, vector<8x48xf32> -> vector<8x48xf32>
    %c1_72 = arith.constant 1 : index
    %c0_73 = arith.constant 0 : index
    %c0_74 = arith.constant 0 : index
    %123 = vector.load %arg10[%c1_72, %c0_73, %c0_74] : memref<2x1x48xf32, #tpu.memory_space<vmem>>, vector<1x1x48xf32>
    %124 = vector.shape_cast %123 : vector<1x1x48xf32> to vector<1x48xf32>
    %125 = vector.broadcast %124 : vector<1x48xf32> to vector<8x48xf32>
    %126 = arith.addf %122, %125 : vector<8x48xf32>
    %c1_75 = arith.constant 1 : index
    %c0_76 = arith.constant 0 : index
    %c0_77 = arith.constant 0 : index
    %127 = vector.load %arg11[%c1_75, %c0_76, %c0_77] : memref<2x16x48xbf16, #tpu.memory_space<vmem>>, vector<1x16x48xbf16>
    %128 = vector.shape_cast %127 : vector<1x16x48xbf16> to vector<16x48xbf16>
    %cst_78 = arith.constant dense<0.000000e+00> : vector<8x48xf32>
    %129 = tpu.matmul %2, %128, %cst_78 {dimension_numbers = #tpu.dot_dimension_numbers<[1], [0], [0], [1], [0, 0, 1, 1], [], []>} : vector<8x16xbf16>, vector<16x48xbf16>, vector<8x48xf32> -> vector<8x48xf32>
    %c1_79 = arith.constant 1 : index
    %c0_80 = arith.constant 0 : index
    %c0_81 = arith.constant 0 : index
    %130 = vector.load %arg12[%c1_79, %c0_80, %c0_81] : memref<2x1x48xf32, #tpu.memory_space<vmem>>, vector<1x1x48xf32>
    %131 = vector.shape_cast %130 : vector<1x1x48xf32> to vector<1x48xf32>
    %132 = vector.broadcast %131 : vector<1x48xf32> to vector<8x48xf32>
    %133 = arith.addf %129, %132 : vector<8x48xf32>
    %134 = vector.extract_strided_slice %126 {offsets = [0, 0], sizes = [8, 16], strides = [1, 1]} : vector<8x48xf32> to vector<8x16xf32>
    %135 = vector.extract_strided_slice %133 {offsets = [0, 0], sizes = [8, 16], strides = [1, 1]} : vector<8x48xf32> to vector<8x16xf32>
    %136 = arith.addf %134, %135 : vector<8x16xf32>
    %137 = arith.negf %136 : vector<8x16xf32>
    %138 = math.exp %137 : vector<8x16xf32>
    %cst_82 = arith.constant 1.000000e+00 : f32
    %139 = vector.broadcast %cst_82 : f32 to vector<8x16xf32>
    %140 = arith.addf %139, %138 : vector<8x16xf32>
    %141 = arith.divf %139, %140 : vector<8x16xf32>
    %142 = vector.extract_strided_slice %126 {offsets = [0, 16], sizes = [8, 16], strides = [1, 1]} : vector<8x48xf32> to vector<8x16xf32>
    %143 = vector.extract_strided_slice %133 {offsets = [0, 16], sizes = [8, 16], strides = [1, 1]} : vector<8x48xf32> to vector<8x16xf32>
    %144 = arith.addf %142, %143 : vector<8x16xf32>
    %145 = arith.negf %144 : vector<8x16xf32>
    %146 = math.exp %145 : vector<8x16xf32>
    %cst_83 = arith.constant 1.000000e+00 : f32
    %147 = vector.broadcast %cst_83 : f32 to vector<8x16xf32>
    %148 = arith.addf %147, %146 : vector<8x16xf32>
    %149 = arith.divf %147, %148 : vector<8x16xf32>
    %150 = vector.extract_strided_slice %126 {offsets = [0, 32], sizes = [8, 16], strides = [1, 1]} : vector<8x48xf32> to vector<8x16xf32>
    %151 = vector.extract_strided_slice %133 {offsets = [0, 32], sizes = [8, 16], strides = [1, 1]} : vector<8x48xf32> to vector<8x16xf32>
    %152 = arith.mulf %141, %151 : vector<8x16xf32>
    %153 = arith.addf %150, %152 : vector<8x16xf32>
    %154 = math.tanh %153 : vector<8x16xf32>
    %cst_84 = arith.constant 1.000000e+00 : f32
    %155 = vector.broadcast %cst_84 : f32 to vector<8x16xf32>
    %156 = arith.subf %155, %149 : vector<8x16xf32>
    %157 = arith.mulf %156, %154 : vector<8x16xf32>
    %158 = arith.mulf %149, %1 : vector<8x16xf32>
    %159 = arith.addf %157, %158 : vector<8x16xf32>
    %cst_85 = arith.constant 0.000000e+00 : f32
    %160 = vector.broadcast %cst_85 : f32 to vector<8x16xf32>
    %161 = arith.maximumf %159, %160 : vector<8x16xf32>
    %162 = tpu.concatenate %90, %161 in 1 : vector<8x16xf32>, vector<8x16xf32> -> vector<8x32xf32>
    %c0_86 = arith.constant 0 : index
    %c0_87 = arith.constant 0 : index
    %163 = vector.load %arg14[%c0_86, %c0_87] : memref<1x16xf32, #tpu.memory_space<vmem>>, vector<1x16xf32>
    %164 = vector.broadcast %163 : vector<1x16xf32> to vector<8x16xf32>
    %165 = arith.addf %1, %164 : vector<8x16xf32>
    %166 = arith.truncf %162 : vector<8x32xf32> to vector<8x32xbf16>
    %c0_88 = arith.constant 0 : index
    %c0_89 = arith.constant 0 : index
    %167 = vector.load %arg13[%c0_88, %c0_89] : memref<32x16xbf16, #tpu.memory_space<vmem>>, vector<32x16xbf16>
    %cst_90 = arith.constant dense<0.000000e+00> : vector<8x16xf32>
    %168 = tpu.matmul %166, %167, %cst_90 {dimension_numbers = #tpu.dot_dimension_numbers<[1], [0], [0], [1], [0, 0, 1, 1], [], []>} : vector<8x32xbf16>, vector<32x16xbf16>, vector<8x16xf32> -> vector<8x16xf32>
    %169 = arith.addf %165, %168 : vector<8x16xf32>
    %c0_91 = arith.constant 0 : index
    %c0_92 = arith.constant 0 : index
    %c0_93 = arith.constant 0 : index
    %170 = vector.load %arg15[%c0_91, %c0_92, %c0_93] : memref<1x8x16xf32, #tpu.memory_space<vmem>>, vector<1x8x16xf32>
    %171 = vector.shape_cast %170 : vector<1x8x16xf32> to vector<8x16xf32>
    %172 = vector.shape_cast %169 : vector<8x16xf32> to vector<1x8x16xf32>
    tpu.vector_store %arg15[%c0_91, %c0_92, %c0_93], %172 {strides = array<i32>} : memref<1x8x16xf32, #tpu.memory_space<vmem>>, vector<1x8x16xf32>,
    return
  }
  func.func @transform_0(%arg0: i32) -> (i32, i32, i32) {
    %c0_i32 = arith.constant 0 : i32
    %c0_i32_0 = arith.constant 0 : i32
    %c0_i32_1 = arith.constant 0 : i32
    return %arg0, %c0_i32, %c0_i32_0 : i32, i32, i32
  }
  func.func @transform_1(%arg0: i32) -> (i32, i32, i32, i32) {
    %c0_i32 = arith.constant 0 : i32
    %c0_i32_0 = arith.constant 0 : i32
    %c0_i32_1 = arith.constant 0 : i32
    %c0_i32_2 = arith.constant 0 : i32
    return %arg0, %c0_i32, %c0_i32_0, %c0_i32_1 : i32, i32, i32, i32
  }
  func.func @transform_2(%arg0: i32) -> (i32, i32, i32) {
    %c0_i32 = arith.constant 0 : i32
    %c0_i32_0 = arith.constant 0 : i32
    %c0_i32_1 = arith.constant 0 : i32
    return %arg0, %c0_i32, %c0_i32_0 : i32, i32, i32
  }
  func.func @transform_3(%arg0: i32) -> (i32, i32, i32) {
    %c0_i32 = arith.constant 0 : i32
    %c0_i32_0 = arith.constant 0 : i32
    %c0_i32_1 = arith.constant 0 : i32
    %c0_i32_2 = arith.constant 0 : i32
    return %c0_i32, %c0_i32_0, %c0_i32_1 : i32, i32, i32
  }
  func.func @transform_4(%arg0: i32) -> (i32, i32, i32) {
    %c0_i32 = arith.constant 0 : i32
    %c0_i32_0 = arith.constant 0 : i32
    %c0_i32_1 = arith.constant 0 : i32
    %c0_i32_2 = arith.constant 0 : i32
    return %c0_i32, %c0_i32_0, %c0_i32_1 : i32, i32, i32
  }
  func.func @transform_5(%arg0: i32) -> (i32, i32, i32) {
    %c0_i32 = arith.constant 0 : i32
    %c0_i32_0 = arith.constant 0 : i32
    %c0_i32_1 = arith.constant 0 : i32
    %c0_i32_2 = arith.constant 0 : i32
    return %c0_i32, %c0_i32_0, %c0_i32_1 : i32, i32, i32
  }
  func.func @transform_6(%arg0: i32) -> (i32, i32, i32) {
    %c0_i32 = arith.constant 0 : i32
    %c0_i32_0 = arith.constant 0 : i32
    %c0_i32_1 = arith.constant 0 : i32
    %c0_i32_2 = arith.constant 0 : i32
    return %c0_i32, %c0_i32_0, %c0_i32_1 : i32, i32, i32
  }
  func.func @transform_7(%arg0: i32) -> (i32, i32, i32) {
    %c0_i32 = arith.constant 0 : i32
    %c0_i32_0 = arith.constant 0 : i32
    %c0_i32_1 = arith.constant 0 : i32
    %c0_i32_2 = arith.constant 0 : i32
    return %c0_i32, %c0_i32_0, %c0_i32_1 : i32, i32, i32
  }
  func.func @transform_8(%arg0: i32) -> (i32, i32, i32) {
    %c0_i32 = arith.constant 0 : i32
    %c0_i32_0 = arith.constant 0 : i32
    %c0_i32_1 = arith.constant 0 : i32
    %c0_i32_2 = arith.constant 0 : i32
    return %c0_i32, %c0_i32_0, %c0_i32_1 : i32, i32, i32
  }
  func.func @transform_9(%arg0: i32) -> (i32, i32, i32) {
    %c0_i32 = arith.constant 0 : i32
    %c0_i32_0 = arith.constant 0 : i32
    %c0_i32_1 = arith.constant 0 : i32
    %c0_i32_2 = arith.constant 0 : i32
    return %c0_i32, %c0_i32_0, %c0_i32_1 : i32, i32, i32
  }
  func.func @transform_10(%arg0: i32) -> (i32, i32, i32) {
    %c0_i32 = arith.constant 0 : i32
    %c0_i32_0 = arith.constant 0 : i32
    %c0_i32_1 = arith.constant 0 : i32
    %c0_i32_2 = arith.constant 0 : i32
    return %c0_i32, %c0_i32_0, %c0_i32_1 : i32, i32, i32
  }
  func.func @transform_11(%arg0: i32) -> (i32, i32, i32) {
    %c0_i32 = arith.constant 0 : i32
    %c0_i32_0 = arith.constant 0 : i32
    %c0_i32_1 = arith.constant 0 : i32
    %c0_i32_2 = arith.constant 0 : i32
    return %c0_i32, %c0_i32_0, %c0_i32_1 : i32, i32, i32
  }
  func.func @transform_12(%arg0: i32) -> (i32, i32) {
    %c0_i32 = arith.constant 0 : i32
    %c0_i32_0 = arith.constant 0 : i32
    %c0_i32_1 = arith.constant 0 : i32
    return %c0_i32, %c0_i32_0 : i32, i32
  }
  func.func @transform_13(%arg0: i32) -> (i32, i32) {
    %c0_i32 = arith.constant 0 : i32
    %c0_i32_0 = arith.constant 0 : i32
    %c0_i32_1 = arith.constant 0 : i32
    return %c0_i32, %c0_i32_0 : i32, i32
  }
  func.func @transform_14(%arg0: i32) -> (i32, i32, i32) {
    %c0_i32 = arith.constant 0 : i32
    %c0_i32_0 = arith.constant 0 : i32
    %c0_i32_1 = arith.constant 0 : i32
    return %arg0, %c0_i32, %c0_i32_0 : i32, i32, i32
  }
}

</mosaic_0001>

<bundles_post_ra>
// kernel: tpu_custom_call.1
= control target key start
LH: loop header
LB: loop body
LE: loop exit
PB: predicated region body
PF: predicated region fallthrough
CT: control target
= control target key end

     0   :  { %s3157_s0 = inlined_call_operand.hbm [shape: f32[2,8,16], index: 0, kind: input, shape index: {}]   ;;  %s3158_s1 = inlined_call_operand.hbm [shape: bf16[2,8,8,8], index: 1, kind: input, shape index: {}]   ;;  %s3159_s2 = inlined_call_operand.hbm [shape: f32[2,8,8], index: 2, kind: input, shape index: {}]   ;;  %s3160_s3 = inlined_call_operand.hbm [shape: bf16[2,16,16], index: 3, kind: input, shape index: {}]   ;;  %s3161_s4 = inlined_call_operand.hbm [shape: f32[2,1,16], index: 4, kind: input, shape index: {}]   ;;  %s3162_s5 = inlined_call_operand.hbm [shape: bf16[2,16,64], index: 5, kind: input, shape index: {}]   ;;  %s3163_s6 = inlined_call_operand.hbm [shape: bf16[2,8,32], index: 6, kind: input, shape index: {}]   ;;  %s3164_s7 = inlined_call_operand.hbm [shape: f32[2,1,32], index: 7, kind: input, shape index: {}]   ;;  %s3165_s8 = inlined_call_operand.vmem [shape: bf16[2,32,48], index: 8, kind: input, shape index: {}]   ;;  %s3166_s9 = inlined_call_operand.hbm [shape: f32[2,1,48], index: 9, kind: input, shape index: {}]   ;;  %s3167_s10 = inlined_call_operand.hbm [shape: bf16[2,16,48], index: 10, kind: input, shape index: {}]   ;;  %s3168_s11 = inlined_call_operand.vmem [shape: f32[2,1,48], index: 11, kind: input, shape index: {}]   ;;  %s3169_s12 = inlined_call_operand.vmem [shape: bf16[32,16], index: 12, kind: input, shape index: {}]   ;;  %s3170_s13 = inlined_call_operand.vmem [shape: f32[1,16], index: 13, kind: input, shape index: {}]   ;;  %s3171_s14 = inlined_call_operand.hbm [shape: f32[2,8,16], index: 14, kind: output, shape index: {}]  }
   0x1   :  { %3197 = sst [smem:[#allocation33_spill]] %s3158_s1 }
   0x2   :  { %3198 = sst [smem:[#allocation34_spill]] %s3160_s3 }
   0x3   :  { %3199 = sst [smem:[#allocation35_spill]] %s3161_s4 }
   0x4   :  { %3200 = sst [smem:[#allocation36_spill]] %s3162_s5 }
   0x5   :  { %3201 = sst [smem:[#allocation37_spill]] %s3164_s7 }
   0x6   :  { %3202 = sst [smem:[#allocation38_spill]] %s3169_s12 }
   0x7   :  { %3203 = sst [smem:[#allocation39_spill]] %s3170_s13 }
   0x8   :  { %3204 = sst [smem:[#allocation40_spill]] %s3171_s14 }
   0x9   :  { %19 = vsyncpa [#allocation3], 0 }
   0xa   :  { %21 = vsyncpa [#allocation3 + $0x1], 0 }
   0xb   :  { %22 = vsyncpa [#allocation6], 0 }
   0xc   :  { %24 = vsyncpa [#allocation6 + $0x1], 0 }
   0xd   :  { %25 = vsyncpa [#allocation9], 0 }
   0xe   :  { %26 = vsyncpa [#allocation12], 0 }
   0xf   :  { %27 = vsyncpa [#allocation15], 0 }
  0x10   :  { %28 = vsyncpa [#allocation18], 0 }
  0x11   :  { %29 = vsyncpa [#allocation4], 0 }
  0x12   :  { %31 = vsyncpa [#allocation4 + $0x1], 0  ;;  %s2675_s29 = smov 0   ;;  %s2677_s30 = smov 0  }
  0x13   :  { %s2679_s15 = smov 0   ;;  %s2681_s16 = smov 0  }
  0x14 LB: > { %3205 = sst [smem:[#allocation27_spill]] %s2565_s29  ;;  %s2579_s17 = smov [#allocation8]   ;;  %s2577_s16 = sphi %s2681_s16, %s3249_s16   ;;  %s2573_s15 = sphi %s2679_s15, %s3251_s15   ;;  %s2569_s30 = sphi %s2677_s30, %s3253_s30   ;;  %s2565_s29 = sphi %s2675_s29, %s3252_s29  }
  0x15   : > { %3206 = sst [smem:[#allocation28_spill]] %s2573_s15  ;;  %s389_s18 = sshll.u32 %s2579_s17, 4  ;;  %s390_s18 = int_to_ptr.vmem [resolvable:$true] %s389_s18 }
  0x16   : > { %s2696_s19 = sadd.s32 4294967295, %s2577_s16   ;;  %p1859_p0 = scmp.ge.s32.totalorder %s2577_s16, 1 }
  0x17   : > { %p3187_p1 = scmp.eq.s32.totalorder %s2696_s19, 0  ;;  %p377_p2 = scmp.lt.s32.totalorder %s2577_s16, 3 }
  0x18   : > { %s2580_s21 = smov [#allocation11]   ;;  %s2581_s24 = smov [#allocation14]  }
  0x19   : > { %p2701_p3 = pnand %p1859_p0, %p377_p2  ;;  %s415_s22 = sshll.u32 %s2580_s21, 4  ;;  %s416_s22 = int_to_ptr.vmem [resolvable:$true] %s415_s22 }
  0x1a   : > { %s441_s25 = sshll.u32 %s2581_s24, 4  ;;  %s2238_s27 = scalar_lea.vmem %s390_s18, 256  ;;  %s442_s25 = int_to_ptr.vmem [resolvable:$true] %s441_s25 }
  0x1b   : > { %s3207_s20 = scalar_select %p2701_p3, 1, 0 }
  0x1c   : > { %p2102_p5 = pneg %p2701_p3  ;;  %p2239_p8 = scmp.ne.s32.totalorder %s390_s18, %s2238_s27 }
  0x1d   : > { %p2246_p11 = scmp.lt.s32.totalorder %s390_s18, %s390_s18  ;;  %p2247_p12 = scmp.lt.s32.totalorder %s2238_s27, %s2238_s27 }
  0x1e   : > { %p2710_p6 = pnand %p2102_p5, %p3187_p1 }
  0x1f   : > { %p2248_p13 = por %p2247_p12, %p2246_p11 }
  0x20   : > { %s3208_s23 = scalar_select %p2710_p6, 1, 0 }
  0x21   : > { %p2716_p7 = pneg %p2710_p6 }
  0x23   : > { %s3209_s26 = scalar_select %p2716_p7, 1, 0 }
  0x24   : > { %p2241_p9 = pnand %p2239_p8, %p2716_p7 }
  0x26   : > { %p2242_p10 = pneg %p2241_p9 }
  0x28   : > { %p2249_p0 = pnand %p2248_p13, %p2242_p10 }
  0x2a   : > { %2252 = shalt.err (!%p2249_p0)
}
  0x2b   : > { %s3173_s28 = smov 64   ;;  %s3175_s17 = smov 4  }
  0x2c   : > { %s3210_s3 = sld [smem:[#allocation34_spill]]  ;;  %s2264_s14 = scalar_lea.vmem %s416_s22, 256 }
  0x2d   : > { %p2265_p2 = scmp.ne.s32.totalorder %s416_s22, %s2264_s14  ;;  %p2272_p9 = scmp.lt.s32.totalorder %s416_s22, %s416_s22 }
  0x2e   : > { %p2273_p10 = scmp.lt.s32.totalorder %s2264_s14, %s2264_s14 }
  0x2f   : > { %p2267_p5 = pnand %p2265_p2, %p2716_p7 }
  0x30   : > { %p2274_p11 = por %p2273_p10, %p2272_p9 }
  0x31   : > { %p2268_p8 = pneg %p2267_p5 }
  0x32   : > { %2105 = dma.hbm_to_vmem [thread:$0]  (!%p2710_p6), %s3210_s3, 256, %s390_s18, [#allocation9], %s3173_s28, %s3173_s28, %s3175_s17  }
  0x33   : > { %p2275_p12 = pnand %p2274_p11, %p2268_p8 }
  0x35   : > { %2278 = shalt.err (!%p2275_p12)
}
  0x36   : > { %s3211_s5 = sld [smem:[#allocation36_spill]]  ;;  %s2290_s18 = scalar_lea.vmem %s442_s25, 32 }
  0x37   : > { %p2291_p13 = scmp.ne.s32.totalorder %s442_s25, %s2290_s18  ;;  %p2298_p5 = scmp.lt.s32.totalorder %s442_s25, %s442_s25 }
  0x38   : > { %p2299_p9 = scmp.lt.s32.totalorder %s2290_s18, %s2290_s18 }
  0x39   : > { %p2293_p0 = pnand %p2291_p13, %p2716_p7 }
  0x3a   : > { %p2300_p8 = por %p2299_p9, %p2298_p5 }
  0x3b   : > { %p2294_p2 = pneg %p2293_p0 }
  0x3c   : > { %2111 = dma.hbm_to_vmem [thread:$0]  (!%p2710_p6), %s3211_s5, 256, %s416_s22, [#allocation12], %s3173_s28, %s3173_s28, %s3175_s17  }
  0x3d   : > { %p2301_p10 = pnand %p2300_p8, %p2294_p2 }
  0x3f   : > { %2304 = shalt.err (!%p2301_p10)
}
  0x40   : > { %s3178_s14 = smov 16   ;;  %s3180_s13 = smov 1  }
  0x41   : > { %s3212_s7 = sld [smem:[#allocation37_spill]]  ;;  %s1858_s24 = sadd.s32 4294967294, %s2577_s16  }
  0x42   : > { %s2752_s27 = sadd.s32 1, %s2577_s16   ;;  %s44_s18 = sadd.s32 1, %s2573_s15 }
  0x43   : > { %3213 = sst [smem:[#allocation29_spill]] %s2752_s27  ;;  %s41_s28 = ssub.s32 %s2577_s16, %s2752_s27 }
  0x44   : > { %p51_p11 = scmp.ne.s32.totalorder %s2573_s15, %s2569_s30  ;;  %p42_p12 = scmp.eq.s32.totalorder %s41_s28, 0 }
  0x45   : > { %p52_p13 = scmp.eq.s32.totalorder %s2577_s16, 0  ;;  %p57_p0 = scmp.ne.s32.totalorder %s2569_s30, %s2565_s29 }
  0x46   : > { %p364_p2 = scmp.eq.s32.totalorder %s2696_s19, 1  ;;  %p370_p10 = scmp.eq.s32.totalorder %s1858_s24, 1 }
  0x47   : > { %2117 = dma.hbm_to_vmem [thread:$0]  (!%p2710_p6), %s3212_s7, 32, %s442_s25, [#allocation15], %s3178_s14, %s3178_s14, %s3180_s13  }
  0x48   : > { %s2764_s17 = scalar_select %p42_p12, %s2573_s15, %s44_s18  }
  0x49   : > { %p53_p5 = por %p52_p13, %p51_p11  ;;  %p2768_p9 = por %p3187_p1, %p57_p0 }
  0x4a   : > { %3214 = sst [smem:[#allocation30_spill]] %s2764_s17  ;;  %p2772_p8 = por %p364_p2, %p51_p11 }
  0x4b   : > { %s3215_s25 = scalar_select %p2768_p9, 1, 0 }
  0x4c   : > { %s3216_s22 = scalar_select %p2772_p8, 1, 0 }
  0x4d   : > { %p2145_p4 = scmp.lt.s32.totalorder %s2577_s16, 2  ;;  %s2778_s21 = sand.u32 1, %s2573_s15  }
  0x4e   : > { %3217 = sst [smem:[#allocation31_spill]] %s3216_s22  ;;  %p2780_p3 = por %p370_p10, %p57_p0 }
  0x4f   : > { %s511_s18 = sand.u32 1, %s2577_s16   ;;  %p2785_p12 = pnand %p2145_p4, %p53_p5 }
  0x50   : > { %s3218_s28 = scalar_select %p2780_p3, 1, 0 }
  0x51   : > { %s1870_s13 = sshll.u32 %s2778_s21, 5  ;;  %s1933_s3 = sshll.u32 %s2577_s16, 9 }
  0x52   : > { %3219 = sst [smem:[#allocation32_spill]] %s3218_s28  ;;  %s515_s17 = scalar_lea.vmem [#allocation5], %s1870_s13 }
  0x53   : > { %s3221_s1 = sld [smem:[#allocation33_spill]]  ;;  %s522_s15 = sshll.u32 %s515_s17, 4  ;;  %s2796_s15 = int_to_ptr.vmem [resolvable:$true] %s522_s15 }
  0x54   : > { %s2798_s27 = scalar_lea.sflag [#allocation6], %s511_s18  ;;  %p2804_p11 = pneg %p2785_p12 }
  0x59   : > { %s2794_s24 = scalar_lea.hbm %s3221_s1, %s1933_s3  ;;  %s2310_s7 = scalar_lea.hbm %s3221_s1, 1024 }
  0x5a   : > { %s2305_s28 = scalar_lea.hbm %s2794_s24, 512  ;;  %p2311_p2 = scmp.lt.s32.totalorder %s2794_s24, %s3221_s1 }
  0x5b   : > { %p2306_p4 = scmp.ne.s32.totalorder %s2794_s24, %s2305_s28  ;;  %p2312_p5 = scmp.lt.s32.totalorder %s2310_s7, %s2305_s28 }
  0x5d   : > { %p2308_p13 = pnand %p2804_p11, %p2306_p4  ;;  %p2313_p10 = por %p2312_p5, %p2311_p2 }
  0x5f   : > { %p2309_p0 = pneg %p2308_p13 }
  0x61   : > { %p2314_p1 = pnand %p2313_p10, %p2309_p0 }
  0x63   : > { %2317 = shalt.err (!%p2314_p1)
}
  0x64   : > { %s2318_s18 = scalar_lea.vmem %s2796_s15, 512  ;;  %s2586_s22 = smov [#allocation5]  }
  0x65   : > { %p2319_p3 = scmp.ne.s32.totalorder %s2796_s15, %s2318_s18  ;;  %s2323_s3 = sshll.u32 %s2586_s22, 4  ;;  %s2324_s3 = int_to_ptr.vmem [resolvable:$false] %s2323_s3 }
  0x66   : > { %s2325_s5 = scalar_lea.vmem %s2324_s3, 1024  ;;  %p2326_p8 = scmp.lt.s32.totalorder %s2796_s15, %s2324_s3 }
  0x67   : > { %p2321_p4 = pnand %p2319_p3, %p2804_p11  ;;  %p2327_p9 = scmp.lt.s32.totalorder %s2325_s5, %s2318_s18 }
  0x69   : > { %p2322_p13 = pneg %p2321_p4  ;;  %p2328_p6 = por %p2327_p9, %p2326_p8 }
  0x6b   : > { %p2329_p7 = pnand %p2328_p6, %p2322_p13 }
  0x6d   : > { %2332 = shalt.err (!%p2329_p7)
}
  0x6e   : > { %s3223_s28 = smov 4   ;;  %s3224_s7 = smov 64  }
  0x6f   : > { %2130 = dma.hbm_to_vmem [thread:$0]  (!%p2785_p12), %s2794_s24, 512, %s2796_s15, %s2798_s27, %s3224_s7, %s3224_s7, %s3223_s28  }
  0x70   : > { %s2587_s17 = smov [#allocation10]   ;;  %s2588_s22 = smov [#allocation13]  }
  0x71   : > { %s402_s13 = sshll.u32 %s2587_s17, 4  ;;  %s428_s1 = sshll.u32 %s2588_s22, 4  ;;  %s403_s13 = int_to_ptr.vmem [resolvable:$true] %s402_s13  ;;  %s429_s1 = int_to_ptr.vmem [resolvable:$true] %s428_s1 }
  0x72   : > { %s2344_s3 = scalar_lea.vmem %s403_s13, 32  ;;  %p3225_p3 = scmp.ne.s32.totalorder %s3209_s26, 0 }
  0x73   : > { %p2345_p1 = scmp.ne.s32.totalorder %s403_s13, %s2344_s3  ;;  %p2352_p9 = scmp.lt.s32.totalorder %s403_s13, %s403_s13 }
  0x74   : > { %p2353_p8 = scmp.lt.s32.totalorder %s2344_s3, %s2344_s3 }
  0x75   : > { %p2347_p6 = pnand %p2345_p1, %p3225_p3 }
  0x76   : > { %p2354_p0 = por %p2353_p8, %p2352_p9 }
  0x77   : > { %p2348_p7 = pneg %p2347_p6 }
  0x79   : > { %p2355_p2 = pnand %p2354_p0, %p2348_p7 }
  0x7b   : > { %2358 = shalt.err (!%p2355_p2)
}
  0x7c   : > { %p3226_p5 = scmp.ne.s32.totalorder %s3208_s23, 0  ;;  %s3227_s18 = smov 1  }
  0x7d   : > { %s3228_s5 = smov 16   ;;  %s3229_s4 = sld [smem:[#allocation35_spill]] }
  0x7e   : > { %s2370_s17 = scalar_lea.vmem %s429_s1, 128  ;;  %p2378_p1 = scmp.lt.s32.totalorder %s429_s1, %s429_s1 }
  0x7f   : > { %p2371_p10 = scmp.ne.s32.totalorder %s429_s1, %s2370_s17  ;;  %p2379_p6 = scmp.lt.s32.totalorder %s2370_s17, %s2370_s17 }
  0x81   : > { %p2373_p4 = pnand %p2371_p10, %p3225_p3  ;;  %p2380_p7 = por %p2379_p6, %p2378_p1 }
  0x83   : > { %2108 = dma.hbm_to_vmem [thread:$0]  (!%p3226_p5), %s3229_s4, 32, %s403_s13, [#allocation9], %s3228_s5, %s3228_s5, %s3227_s18  }
  0x84   : > { %p2374_p13 = pneg %p2373_p4 }
  0x86   : > { %p2381_p9 = pnand %p2380_p7, %p2374_p13 }
  0x88   : > { %2384 = shalt.err (!%p2381_p9)
}
  0x89   : > { %2114 = dma.hbm_to_vmem [thread:$0]  (!%p3226_p5), %s3163_s6, 128, %s429_s1, [#allocation12], %s3224_s7, %s3224_s7, %s3223_s28  }
  0x8a   : > { %s2589_s13 = smov [#allocation16]   ;;  %s2590_s24 = smov [#allocation17]  }
  0x8b   : > { %s457_s15 = sshll.u32 %s2589_s13, 4  ;;  %s470_s4 = sshll.u32 %s2590_s24, 4  ;;  %s458_s15 = int_to_ptr.vmem [resolvable:$true] %s457_s15  ;;  %s471_s4 = int_to_ptr.vmem [resolvable:$true] %s470_s4 }
  0x8c   : > { %s2396_s12 = scalar_lea.vmem %s458_s15, 32  ;;  %p2404_p10 = scmp.lt.s32.totalorder %s458_s15, %s458_s15 }
  0x8d   : > { %p2397_p8 = scmp.ne.s32.totalorder %s458_s15, %s2396_s12  ;;  %p2405_p4 = scmp.lt.s32.totalorder %s2396_s12, %s2396_s12 }
  0x8f   : > { %p2399_p0 = pnand %p2397_p8, %p3225_p3  ;;  %p2406_p13 = por %p2405_p4, %p2404_p10 }
  0x91   : > { %p2400_p2 = pneg %p2399_p0 }
  0x93   : > { %p2407_p1 = pnand %p2406_p13, %p2400_p2 }
  0x95   : > { %2410 = shalt.err (!%p2407_p1)
}
  0x96   : > { %2120 = dma.hbm_to_vmem [thread:$0]  (!%p3226_p5), %s3166_s9, 32, %s458_s15, [#allocation15], %s3228_s5, %s3228_s5, %s3227_s18  }
  0x97   : > { %s2422_s22 = scalar_lea.vmem %s471_s4, 256  ;;  %p2430_p8 = scmp.lt.s32.totalorder %s471_s4, %s471_s4 }
  0x98   : > { %p2423_p6 = scmp.ne.s32.totalorder %s471_s4, %s2422_s22  ;;  %p2431_p0 = scmp.lt.s32.totalorder %s2422_s22, %s2422_s22 }
  0x9a   : > { %p2425_p7 = pnand %p2423_p6, %p3225_p3  ;;  %p2432_p2 = por %p2431_p0, %p2430_p8 }
  0x9c   : > { %p2426_p9 = pneg %p2425_p7 }
  0x9e   : > { %p2433_p10 = pnand %p2432_p2, %p2426_p9 }
  0xa0   : > { %2436 = shalt.err (!%p2433_p10)
}
  0xa1   : > { %2123 = dma.hbm_to_vmem [thread:$0]  (!%p3226_p5), %s3167_s10, 256, %s471_s4, [#allocation18], %s3224_s7, %s3224_s7, %s3223_s28  }
  0xa2   : > { %s1868_s26 = sshll.u32 %s2778_s21, 3  ;;  %s1869_s18 = sshll.u32 %s2577_s16, 7 }
  0xa3   : > { %s2875_s15 = scalar_lea.hbm %s3157_s0, %s1869_s18  ;;  %s497_s23 = scalar_lea.vmem [#allocation2], %s1868_s26 }
  0xa4   : > { %s504_s24 = sshll.u32 %s497_s23, 4  ;;  %s2882_s22 = scalar_lea.hbm %s3159_s2, %s1869_s18  ;;  %s505_s24 = int_to_ptr.vmem [resolvable:$true] %s504_s24 }
  0xa5   : > { %s494_s4 = scalar_lea.sflag [#allocation3], %s2778_s21  ;;  %s2437_s28 = scalar_lea.hbm %s2875_s15, 128 }
  0xa6   : > { %p2438_p3 = scmp.ne.s32.totalorder %s2875_s15, %s2437_s28  ;;  %s2442_s3 = scalar_lea.hbm %s3157_s0, 256 }
  0xa7   : > { %p2443_p13 = scmp.lt.s32.totalorder %s2875_s15, %s3157_s0  ;;  %p2444_p1 = scmp.lt.s32.totalorder %s2442_s3, %s2437_s28 }
  0xa8   : > { %p2440_p5 = pnand %p2438_p3, %p2804_p11 }
  0xa9   : > { %p2445_p6 = por %p2444_p1, %p2443_p13 }
  0xaa   : > { %p2441_p4 = pneg %p2440_p5 }
  0xac   : > { %p2446_p7 = pnand %p2445_p6, %p2441_p4 }
  0xae   : > { %2449 = shalt.err (!%p2446_p7)
}
  0xaf   : > { %s2450_s18 = scalar_lea.vmem %s505_s24, 128  ;;  %s2591_s23 = smov [#allocation2]  }
  0xb0   : > { %p2451_p9 = scmp.ne.s32.totalorder %s505_s24, %s2450_s18  ;;  %s2455_s1 = sshll.u32 %s2591_s23, 4  ;;  %s2456_s1 = int_to_ptr.vmem [resolvable:$false] %s2455_s1 }
  0xb1   : > { %s2457_s17 = scalar_lea.vmem %s2456_s1, 256  ;;  %p2458_p2 = scmp.lt.s32.totalorder %s505_s24, %s2456_s1 }
  0xb2   : > { %p2453_p8 = pnand %p2451_p9, %p2804_p11  ;;  %p2459_p10 = scmp.lt.s32.totalorder %s2457_s17, %s2450_s18 }
  0xb4   : > { %p2454_p0 = pneg %p2453_p8  ;;  %p2460_p3 = por %p2459_p10, %p2458_p2 }
  0xb6   : > { %p2461_p5 = pnand %p2460_p3, %p2454_p0 }
  0xb8   : > { %2464 = shalt.err (!%p2461_p5)
}
  0xb9   : > { %2127 = dma.hbm_to_vmem [thread:$0]  (!%p2785_p12), %s2875_s15, 128, %s505_s24, %s494_s4  }
  0xba   : > { %s536_s28 = scalar_lea.vmem [#allocation7], %s1868_s26  ;;  %s2465_s12 = scalar_lea.hbm %s2882_s22, 128 }
  0xbb   : > { %s543_s7 = sshll.u32 %s536_s28, 4  ;;  %p2466_p4 = scmp.ne.s32.totalorder %s2882_s22, %s2465_s12  ;;  %s544_s7 = int_to_ptr.vmem [resolvable:$true] %s543_s7 }
  0xbc   : > { %s2470_s13 = scalar_lea.hbm %s3159_s2, 256  ;;  %p2471_p6 = scmp.lt.s32.totalorder %s2882_s22, %s3159_s2 }
  0xbd   : > { %p2468_p13 = pnand %p2466_p4, %p2804_p11  ;;  %p2472_p7 = scmp.lt.s32.totalorder %s2470_s13, %s2465_s12 }
  0xbf   : > { %p2469_p1 = pneg %p2468_p13  ;;  %p2473_p9 = por %p2472_p7, %p2471_p6 }
  0xc1   : > { %p2474_p8 = pnand %p2473_p9, %p2469_p1 }
  0xc3   : > { %2477 = shalt.err (!%p2474_p8)
}
  0xc4   : > { %s2478_s21 = scalar_lea.vmem %s544_s7, 128  ;;  %s2592_s26 = smov [#allocation7]  }
  0xc5   : > { %p2479_p0 = scmp.ne.s32.totalorder %s544_s7, %s2478_s21  ;;  %s2483_s15 = sshll.u32 %s2592_s26, 4  ;;  %s2484_s15 = int_to_ptr.vmem [resolvable:$false] %s2483_s15 }
  0xc6   : > { %s2485_s24 = scalar_lea.vmem %s2484_s15, 256  ;;  %p2486_p3 = scmp.lt.s32.totalorder %s544_s7, %s2484_s15 }
  0xc7   : > { %p2481_p2 = pnand %p2479_p0, %p2804_p11  ;;  %p2487_p5 = scmp.lt.s32.totalorder %s2485_s24, %s2478_s21 }
  0xc9   : > { %p2482_p10 = pneg %p2481_p2  ;;  %p2488_p4 = por %p2487_p5, %p2486_p3 }
  0xcb   : > { %p2489_p13 = pnand %p2488_p4, %p2482_p10 }
  0xcd   : > { %2492 = shalt.err (!%p2489_p13)
}
  0xce   : > { %2133 = dma.hbm_to_vmem [thread:$0]  (!%p2785_p12), %s2882_s22, 128, %s544_s7, %s2798_s27  }
  0xcf   : > { %p3230_p1 = scmp.ne.s32.totalorder %s3207_s20, 0 }
  0xd0   : > { %s2923_s29 = sand.u32 (!%p3230_p1), 1, %s2569_s30   ;;  %p3231_p11 = scmp.ne.s32.totalorder (!%p3230_p1), %s3215_s25, 0 }
  0xd1   : > { %552 = sbr.rel (%p3230_p1) target bundleno = 2364 (0x93c), region = 76  ;;  %s2926_s4 = sshll.u32 (!%p3230_p1), %s2923_s29, 3 }
  0xd2   : > { %s555_s1 = scalar_lea.sflag (!%p3230_p1), [#allocation3], %s2923_s29  ;;  %s558_s17 = scalar_lea.vmem (!%p3230_p1), [#allocation2], %s2926_s4 }
  0xd6   : > { %2536 = dma.done.wait (%p3231_p11), %s555_s1, 128  }
  0xd7   : > { %2538 = vsyncadd (%p3231_p11), %s555_s1, 4294967168  ;;  %s563_s20 = sand.u32 1, %s2696_s19   ;;  %s1877_s14 = sshll.u32 %s2923_s29, 5 }
  0xd8   : > { %s564_s27 = scalar_lea.sflag [#allocation6], %s563_s20  ;;  %s2936_s22 = scalar_lea.vmem [#allocation5], %s1877_s14 }
  0xd9   : > { %2540 = dma.done.wait (%p3231_p11), %s564_s27, 640  }
  0xda   : > { %2542 = vsyncadd (%p3231_p11), %s564_s27, 4294966656  ;;  %s576_s28 = scalar_lea.vmem [#allocation7], %s2926_s4  ;;  %p3232_p12 = scmp.eq.s32.totalorder %s2696_s19, 0 }
  0xdc   : > { %2544 = dma.done.wait (%p3232_p12), [#allocation9], 288   ;;  %p3233_p6 = pmov %p3232_p12 }
  0xde   : > { %2546 = vsyncadd (%p3233_p6), [#allocation9], 4294967008  ;;  %p3234_p7 = pmov %p3233_p6 }
  0xdf   : > { %p3235_p9 = pmov %p3233_p6 }
  0xe0   : > { %2548 = dma.done.wait (%p3234_p7), [#allocation12], 384  }
  0xe1   : > { %2550 = vsyncadd (%p3235_p9), [#allocation12], 4294966912  ;;  %p3236_p8 = pmov %p3233_p6 }
  0xe2   : > { %p3237_p0 = pmov %p3233_p6 }
  0xe3   : > { %2552 = dma.done.wait (%p3236_p8), [#allocation15], 64  }
  0xe4   : > { %2554 = vsyncadd (%p3237_p0), [#allocation15], 4294967232  ;;  %p3238_p2 = pmov %p3237_p0 }
  0xe5   : > { %p3239_p10 = pmov %p3237_p0 }
  0xe6   : > { %2556 = dma.done.wait (%p3238_p2), [#allocation18], 256  }
  0xe7   : > { %2558 = vsyncadd (%p3239_p10), [#allocation18], 4294967040  ;;  %v2593_v0 = vmov 0.0   ;;  %vm2594_vm0 = vmmov 0   ;;  %v2203_v1 = vld [vmem:[#allocation8] sm:$0xff]   ;;  %vm830_vm1 = vcmask 130048   ;;  %v687_v6 = vlaneseq }
  0xe8   : > { %1982 = vmatprep.subr.bf16.mxu0 %v2593_v0  ;;  %1984 = vmatprep.mubr.msk.bf16.mxu0 %vm2594_vm0, %v2593_v0  ;;  %v2965_v2 = vld [vmem:[%s558_s17] sm:$0xff]  ;;  %v2204_v4 = vld [vmem:[#allocation11] sm:$0xff]   ;;  %vm667_vm3 = vcmask 64512   ;;  %v1888_v26 = vld [vmem:[#allocation10] ss:$0 sm:$0xff]  ;;  %vm933_vm4 = vcmask 1043456  }
  0xe9   : > { %1988 = vmatprep.subr.bf16.mxu1 %v2593_v0  ;;  %1990 = vmatprep.mubr.msk.bf16.mxu1 %vm2594_vm0, %v2593_v0  ;;  %v2969_v3 = vpack.c.bf16 %v2965_v2, %v2965_v2  ;;  %v662_v5 = vld [vmem:[%s576_s28] sm:$0xff]  ;;  %v688_v7 = vshrl.u32 %v687_v6, 7  ;;  %v1951_v38 = vld [vmem:[%s2936_s22 + $0x10] sm:$0xff]   ;;  %v1952_v43 = vld [vmem:[%s2936_s22 + $0x18] sm:$0xff]   ;;  %vm994_vm5 = vcmask 1041409   ;;  %vm996_vm6 = vcmask 1042434  }
  0xea   : > { %1983 = vmatpush3.bf16.msra.mxu0 %v2203_v1  ;;  %1989 = vmatpush3.bf16.msra.mxu1 %v2204_v4  ;;  %vm663_vm2 = vcmp.ne.f32.partialorder %v662_v5, 0.0  ;;  %v1950_v34 = vld [vmem:[%s2936_s22 + $0x8] sm:$0xff]   ;;  %v1945_v41 = vunpack.c.h.bf16 %v1951_v38  ;;  %v1949_v47 = vunpack.c.h.bf16 %v1952_v43  ;;  %v1935_v60 = vld [vmem:[%s2936_s22] sm:$0xff]   ;;  %v977_v62 = vld [vmem:[#allocation13] sm:$0xf]  ;;  %vm998_vm7 = vcmask 1043459  }
  0xeb   : > { %1994 = vmatprep.subr.bf16.mxu0 %v2593_v0  ;;  %2000 = vmatprep.subr.bf16.mxu1 %v2593_v0  ;;  %v2978_v8 = vsel %vm663_vm2, 1.0, %v2593_v0  ;;  %v703_v9 = vsub.s32 2, %v688_v7  ;;  %v710_v10 = vsub.s32 3, %v688_v7  ;;  %v689_v11 = vsub.s32 0, %v688_v7  ;;  %s2595_s25 = smov 96   ;;  %s2596_s26 = smov 32  }
  0xec   : > { %v696_v12 = vsub.s32 1, %v688_v7  ;;  %v724_v16 = vsub.s32 5, %v688_v7  ;;  %v717_v18 = vsub.s32 4, %v688_v7  ;;  %v738_v20 = vsub.s32 7, %v688_v7  ;;  %s2597_s20 = smov 112   ;;  %s2598_s14 = smov 16  }
  0xed   : > { %1985 = vmatmul.mubr.msk.bf16.vlgmr.msra.gmra.mxu0 %vm830_vm1, %v2969_v3  ;;  %v704_v13 = vrot.slane %v2978_v8, %v703_v9  ;;  %v690_v14 = vrot.slane %v2978_v8, %v689_v11  ;;  %v711_v15 = vrot.slane %v2978_v8, %v710_v10  ;;  %v731_v22 = vsub.s32 6, %v688_v7  ;;  %s3240_s28 = sld [smem:[#allocation38_spill]]  ;;  %s1930_s18 = sshll.u32 %s2696_s19, 7 }
  0xee   : > { %1996 = vmatprep.mubr.msk.bf16.mxu0 %vm2594_vm0, %v2593_v0  ;;  %v697_v17 = vrot.slane %v2978_v8, %v696_v12  ;;  %v725_v19 = vrot.slane %v2978_v8, %v724_v16  ;;  %v718_v21 = vrot.slane %v2978_v8, %v717_v18  ;;  %v739_v23 = vrot.slane %v2978_v8, %v738_v20  ;;  %s3241_s5 = sld [smem:[#allocation39_spill]]  ;;  %s658_s23 = scalar_lea.vmem [#allocation19], %s2926_s4 }
  0xef   : > { %706 = vbcast.lane.b32.xlu1 %v704_v13, 256  ;;  %692 = vbcast.lane.b32.xlu0 %v690_v14, 256  ;;  %v732_v24 = vrot.slane %v2978_v8, %v731_v22  ;;  %v668_v25 = vsel %vm667_vm3, %v2978_v8, 0.0  ;;  %v1940_v35 = vunpack.c.l.bf16 %v1950_v34  ;;  %v1941_v36 = vunpack.c.h.bf16 %v1950_v34  ;;  %s3242_s13 = sld [smem:[#allocation31_spill]]  ;;  %s1678_s21 = sshll.u32 %s658_s23, 4  ;;  %s3115_s21 = int_to_ptr.vmem [resolvable:$true] %s1678_s21 }
  0xf0   : > { %v1936_v1 = vunpack.c.l.bf16 %v1935_v60  ;;  %v1937_v4 = vunpack.c.h.bf16 %v1935_v60  ;;  %v1013_v7 = vsel %vm933_vm4, %v977_v62, 0  ;;  %vm1000_vm8 = vcmask 1044484   ;;  %s3243_s24 = sld [smem:[#allocation40_spill]]  ;;  %s1665_s17 = scalar_lea.sflag [#allocation4], %s2923_s29 }
  0xf1   : > { %vm1002_vm9 = vcmask 1045509   ;;  %vm1004_vm10 = vcmask 1046534   ;;  %vm1006_vm11 = vcmask 1047559   ;;  %vm1091_vm12 = vcmask 261120   ;;  %s2493_s19 = scalar_lea.vmem %s3115_s21, 128  ;;  %s2599_s4 = smov [#allocation19]  }
  0xf2   : > { %p2494_p3 = scmp.ne.s32.totalorder %s3115_s21, %s2493_s19 }
  0xf3   : > { %713 = vbcast.lane.b32.xlu1 %v711_v15, 256  ;;  %699 = vbcast.lane.b32.xlu0 %v697_v17, 256  ;;  %v1944_v15 = vunpack.c.l.bf16 %v1951_v38 }
  0xf5   : > { %p3244_p5 = scmp.ne.s32.totalorder %s3242_s13, 0 }
  0xf6   : > { %s3113_s1 = scalar_lea.hbm %s3243_s24, %s1930_s18 }
  0xf7   : > { %727 = vbcast.lane.b32.xlu1 %v725_v19, 256  ;;  %720 = vbcast.lane.b32.xlu0 %v718_v21, 256  ;;  %p2495_p4 = pnand %p2494_p3, %p3244_p5 }
  0xf9   : > { %p2496_p13 = pneg %p2495_p4 }
  0xfb   : > { %741 = vbcast.lane.b32.xlu1 %v739_v23, 256  ;;  %734 = vbcast.lane.b32.xlu0 %v732_v24, 256 }
 0x11f   : > { %669 = vadd.xlane.f32.xlu1 %v668_v25 }
 0x161   : > { %v707_v33 = vpop.permute.xlu1 %706  ;;  %v693_v61 = vpop.permute.xlu0 %692 }
 0x162   : > { %v745_v39 = vmul.f32 %v1940_v35, %v707_v33  ;;  %v743_v6 = vmul.f32 %v1936_v1, %v693_v61 }
 0x164   : > { %v765_v44 = vsel %vm667_vm3, %v745_v39, 0.0  ;;  %v751_v13 = vsel %vm667_vm3, %v743_v6, 0.0 }
 0x165   : > { %v714_v37 = vpop.permute.xlu1 %713  ;;  %v766_v48 = vrot.slane %v765_v44, 4  ;;  %v700_v11 = vpop.permute.xlu0 %699  ;;  %v752_v16 = vrot.slane %v751_v13, 4 }
 0x166   : > { %v746_v40 = vmul.f32 %v1941_v36, %v714_v37  ;;  %v744_v14 = vmul.f32 %v1937_v4, %v700_v11 }
 0x167   : > { %v767_v53 = vadd.f32 %v766_v48, %v765_v44  ;;  %v753_v20 = vadd.f32 %v752_v16, %v751_v13 }
 0x168   : > { %v772_v45 = vsel %vm667_vm3, %v746_v40, 0.0  ;;  %v758_v18 = vsel %vm667_vm3, %v744_v14, 0.0 }
 0x169   : > { %v728_v42 = vpop.permute.xlu1 %727  ;;  %v773_v49 = vrot.slane %v772_v45, 4  ;;  %v768_v57 = vrot.slane %v767_v53, 2  ;;  %v759_v21 = vrot.slane %v758_v18, 4  ;;  %v721_v22 = vpop.permute.xlu0 %720 }
 0x16a   : > { %v748_v46 = vmul.f32 %v1945_v41, %v728_v42  ;;  %v747_v25 = vmul.f32 %v1944_v15, %v721_v22 }
 0x16b   : > { %v774_v54 = vadd.f32 %v773_v49, %v772_v45  ;;  %v769_v5 = vadd.f32 %v768_v57, %v767_v53 }
 0x16c   : > { %v786_v50 = vsel %vm667_vm3, %v748_v46, 0.0 }
 0x16d   : > { %v742_v51 = vpop.permute.xlu1 %741  ;;  %v787_v55 = vrot.slane %v786_v50, 4  ;;  %v775_v58 = vrot.slane %v774_v54, 2  ;;  %v770_v17 = vrot.slane %v769_v5, 1  ;;  %v735_v34 = vpop.permute.xlu0 %734 }
 0x16e   : > { %v750_v52 = vmul.f32 %v1949_v47, %v742_v51 }
 0x16f   : > { %v788_v59 = vadd.f32 %v787_v55, %v786_v50  ;;  %v776_v9 = vadd.f32 %v775_v58, %v774_v54 }
 0x170   : > { %v800_v56 = vsel %vm667_vm3, %v750_v52, 0.0 }
 0x171   : > { %v801_v63 = vrot.slane %v800_v56, 4  ;;  %v789_v10 = vrot.slane %v788_v59, 2  ;;  %v777_v19 = vrot.slane %v776_v9, 1 }
 0x173   : > { %v802_v12 = vadd.f32 %v801_v63, %v800_v56  ;;  %v790_v23 = vadd.f32 %v789_v10, %v788_v59  ;;  %v778_v35 = vadd.f32 %v777_v19, %v776_v9 }
 0x175   : > { %v803_v24 = vrot.slane %v802_v12, 2  ;;  %v791_v36 = vrot.slane %v790_v23, 1  ;;  %v810_v48 = vpack.c.bf16 %v778_v35, %v778_v35  ;;  %v2205_v35 = vld [vmem:[%s3165_s8 + $0x8] sm:$0xff]  }
 0x177   : > { %v804_v37 = vadd.f32 %v803_v24, %v802_v12  ;;  %v792_v49 = vadd.f32 %v791_v36, %v790_v23  ;;  %v989_v60 = vunpack.c.l.b16 %v810_v48  ;;  %v2207_v36 = vld [vmem:[#allocation17] sm:$0xff]  }
 0x178   : > { %v2208_v48 = vld [vmem:[#allocation8 + $0x8] sm:$0xff]  }
 0x179   : > { %v805_v50 = vrot.slane %v804_v37, 1  ;;  %v812_v61 = vpack.c.bf16 %v792_v49, %v792_v49 }
 0x17b   : > { %v806_v62 = vadd.f32 %v805_v50, %v804_v37  ;;  %v991_v9 = vunpack.c.l.b16 %v812_v61  ;;  %v1895_v37 = vld [vmem:[#allocation14] ss:$0 sm:$0xff]  ;;  %v1379_v61 = vld [vmem:[#allocation13 + $0x4] sm:$0xf] }
 0x17d   : > { %v814_v10 = vpack.c.bf16 %v806_v62, %v806_v62 }
 0x1ad   : > { %v868_v27 = vpop.f32.mrf.mxu0 }
 0x1ae   : > { %v869_v28 = vadd.f32 %v1888_v26, %v868_v27  ;;  %v1948_v26 = vunpack.c.l.bf16 %v1952_v43  ;;  %v754_v27 = vrot.slane %v753_v20, 2 }
 0x1af   : > { %v1986_v29 = vpop.f32.mrf.mxu0 }
 0x1b0   : > { %v874_v30 = vpack.c.bf16 %v869_v28, %v869_v28  ;;  %v760_v28 = vadd.f32 %v759_v21, %v758_v18  ;;  %v771_v29 = vadd.f32 %v770_v17, %v769_v5  ;;  %v749_v38 = vmul.f32 %v1948_v26, %v735_v34 }
 0x1b1   : > { %v871_v31 = vpop.f32.mrf.mxu0  ;;  %v993_v17 = vunpack.c.l.b16 %v814_v10  ;;  %v3017_v34 = vpack.c.bf16 %v2978_v8, %v2978_v8  ;;  %v2206_v8 = vld [vmem:[%s3165_s8] sm:$0xff]  }
 0x1b2   : > { %1991 = vmatmul.mubr.msk.bf16.vlgmr.msra.gmra.mxu1 %vm830_vm1, %v874_v30  ;;  %v779_v30 = vsel %vm667_vm3, %v747_v25, 0.0  ;;  %v755_v31 = vadd.f32 %v754_v27, %v753_v20  ;;  %v809_v42 = vpack.c.bf16 %v771_v29, %v771_v29  ;;  %v793_v44 = vsel %vm667_vm3, %v749_v38, 0.0 }
 0x1b3   : > { %v1987_v32 = vpop.f32.mrf.mxu0  ;;  %2002 = vmatprep.mubr.msk.bf16.mxu1 %vm2594_vm0, %v2593_v0  ;;  %2001 = vmatpush3.bf16.msra.mxu1 %v1013_v7  ;;  %v780_v33 = vrot.slane %v779_v30, 4  ;;  %v794_v47 = vrot.slane %v793_v44, 4 }
 0x1b4   : > { %2014 = vmatprep.subr.bf16.mxu1 %v2593_v0  ;;  %v761_v32 = vrot.slane %v760_v28, 2  ;;  %v756_v39 = vrot.slane %v755_v31, 1  ;;  %v988_v55 = vunpack.c.l.b16 %v809_v42 }
 0x1b5   : > { %v781_v41 = vadd.f32 %v780_v33, %v779_v30  ;;  %v795_v54 = vadd.f32 %v794_v47, %v793_v44 }
 0x1b6   : > { %v762_v40 = vadd.f32 %v761_v32, %v760_v28  ;;  %v757_v43 = vadd.f32 %v756_v39, %v755_v31  ;;  %v3037_v39 = vpop.xlane.xlu1 %669 }
 0x1b7   : > { %v782_v46 = vrot.slane %v781_v41, 2  ;;  %v796_v59 = vrot.slane %v795_v54, 2 }
 0x1b8   : > { %v763_v45 = vrot.slane %v762_v40, 1  ;;  %v807_v51 = vpack.c.bf16 %v757_v43, %v757_v43 }
 0x1b9   : > { %v783_v53 = vadd.f32 %v782_v46, %v781_v41  ;;  %v797_v4 = vadd.f32 %v796_v59, %v795_v54  ;;  %v2209_v54 = vld [vmem:[#allocation11 + $0x8] sm:$0xff]   ;;  %v1904_v59 = vld [vmem:[#allocation10 + $0x1] ss:$0 sm:$0xff] }
 0x1ba   : > { %v764_v52 = vadd.f32 %v763_v45, %v762_v40  ;;  %v986_v56 = vunpack.c.l.b16 %v807_v51 }
 0x1bb   : > { %v784_v58 = vrot.slane %v783_v53, 1  ;;  %v798_v7 = vrot.slane %v797_v4, 1 }
 0x1bc   : > { %v808_v57 = vpack.c.bf16 %v764_v52, %v764_v52 }
 0x1bd   : > { %v785_v1 = vadd.f32 %v784_v58, %v783_v53  ;;  %v799_v14 = vadd.f32 %v798_v7, %v797_v4  ;;  %v1381_v4 = vsel %vm933_vm4, %v1379_v61, 0  ;;  %v2210_v7 = vld [vmem:[#allocation17 + $0x8] sm:$0xff]  }
 0x1be   : > { %v987_v63 = vunpack.c.l.b16 %v808_v57 }
 0x1bf   : > { %v811_v6 = vpack.c.bf16 %v785_v1, %v785_v1  ;;  %v813_v16 = vpack.c.bf16 %v799_v14, %v799_v14 }
 0x1c0   : > { %v995_v5 = vsel %vm994_vm5, %v987_v63, %v986_v56 }
 0x1c1   : > { %v997_v11 = vsel %vm996_vm6, %v988_v55, %v995_v5  ;;  %v990_v13 = vunpack.c.l.b16 %v811_v6  ;;  %v992_v19 = vunpack.c.l.b16 %v813_v16 }
 0x1c2   : > { %v999_v12 = vsel %vm998_vm7, %v989_v60, %v997_v11  ;;  %v1900_v11 = vld [vmem:[%s3168_s11] ss:$0 sm:$0xff] }
 0x1c3   : > { %v1001_v15 = vsel %vm1000_vm8, %v990_v13, %v999_v12 }
 0x1c4   : > { %v1003_v18 = vsel %vm1002_vm9, %v991_v9, %v1001_v15 }
 0x1c5   : > { %v1005_v20 = vsel %vm1004_vm10, %v992_v19, %v1003_v18 }
 0x1c6   : > { %v1007_v21 = vsel %vm1006_vm11, %v993_v17, %v1005_v20 }
 0x1c7   : > { %v3007_v22 = vpack.c.b16 %v1007_v21, %v1007_v21 }
 0x1c9   : > { %2003 = vmatmul.mubr.msk.bf16.vlgmr.msra.gmra.mxu1 %vm667_vm3, %v3007_v22 }
 0x1ca   : > { %2016 = vmatprep.mubr.msk.bf16.mxu1 %vm2594_vm0, %v2593_v0  ;;  %2015 = vmatpush3.bf16.msra.mxu1 %v2207_v36  ;;  %v2211_v36 = vld [vmem:[%s3165_s8 + $0x18] sm:$0xff]  }
 0x1cb   : > { %2026 = vmatprep.subr.bf16.mxu1 %v2593_v0 }
 0x1d1   : > { %2017 = vmatmul.mubr.msk.bf16.vlgmr.msra.gmra.mxu1 %vm830_vm1, %v2969_v3 }
 0x1d2   : > { %2028 = vmatprep.mubr.msk.bf16.mxu1 %vm2594_vm0, %v2593_v0  ;;  %2027 = vmatpush3.bf16.msra.mxu1 %v2209_v54 }
 0x1d3   : > { %2038 = vmatprep.subr.bf16.mxu1 %v2593_v0 }
 0x272   : > { %v920_v23 = vpop.f32.mrf.mxu1 }
 0x273   : > { %v926_v24 = vpack.c.bf16 %v920_v23, %v920_v23  ;;  %v1062_v38 = vadd.f32 %v1895_v37, %v920_v23  ;;  %v2212_v37 = vld [vmem:[%s3165_s8 + $0x10] sm:$0xff]  }
 0x274   : > { %v1992_v25 = vpop.f32.mrf.mxu1 }
 0x275   : > { %928 = vrot.lane.b32.xlu0 %v926_v24, %s2595_s25  ;;  %v1063_v40 = vmul.f32 %v1062_v38, %v3037_v39  ;;  %v1896_v25 = vld [vmem:[#allocation16] ss:$0 sm:$0xff] }
 0x276   : > { %v923_v26 = vpop.f32.mrf.mxu1 }
 0x278   : > { %v1993_v27 = vpop.f32.mrf.mxu1 }
 0x289   : > { %v1049_v28 = vpop.f32.mrf.mxu1 }
 0x28b   : > { %v2004_v29 = vpop.f32.mrf.mxu1 }
 0x28d   : > { %v1052_v30 = vpop.f32.mrf.mxu1 }
 0x28f   : > { %v2005_v31 = vpop.f32.mrf.mxu1 }
 0x291   : > { %v1184_v50 = vpop.f32.mrf.mxu1 }
 0x292   : > { %v1185_v14 = vadd.f32 %v1900_v11, %v1184_v50 }
 0x293   : > { %v2018_v51 = vpop.f32.mrf.mxu1 }
 0x295   : > { %v1187_v52 = vpop.f32.mrf.mxu1 }
 0x297   : > { %v2019_v53 = vpop.f32.mrf.mxu1 }
 0x2e7   : > { %v929_v32 = vpop.permute.xlu0 %928 }
 0x2e8   : > { %v935_v33 = vsel %vm933_vm4, %v929_v32, 0 }
 0x2e9   : > { %1995 = vmatpush3.bf16.msra.mxu0 %v935_v33 }
 0x2ea   : > { %2006 = vmatprep.subr.bf16.mxu0 %v2593_v0 }
 0x2ec   : > { %1997 = vmatmul.mubr.msk.bf16.vlgmr.msra.gmra.mxu0 %vm667_vm3, %v3017_v34 }
 0x2ed   : > { %2010 = vmatprep.mubr.msk.bf16.mxu0 %vm2594_vm0, %v2593_v0  ;;  %2007 = vmatpush3.bf16.msra.mxu0 %v2205_v35 }
 0x2ee   : > { %2008 = vmatprep.subr.bf16.mxu0 %v2593_v0 }
 0x2f1   : > { %2009 = vmatpush3.bf16.msra.mxu0 %v2206_v8 }
 0x2f2   : > { %2020 = vmatprep.subr.bf16.mxu0 %v2593_v0 }
 0x3ac   : > { %v971_v41 = vpop.f32.mrf.mxu0 }
 0x3ad   : > { %v1064_v42 = vadd.f32 %v1063_v40, %v971_v41 }
 0x3ae   : > { %v1998_v44 = vpop.f32.mrf.mxu0 }
 0x3af   : > { %v1065_v43 = vadd.f32 %v1064_v42, %v1049_v28 }
 0x3b0   : > { %v974_v45 = vpop.f32.mrf.mxu0 }
 0x3b1   : > { %v1066_v46 = vmax.f32 %v1065_v43, 0.0 }
 0x3b2   : > { %v1999_v47 = vpop.f32.mrf.mxu0 }
 0x3b3   : > { %v1067_v49 = vpack.c.bf16 %v1066_v46, %v1066_v46 }
 0x3b5   : > { %2011 = vmatmul.mubr.msk.bf16.vlgmr.msra.gmra.mxu0 %vm1091_vm12, %v1067_v49  ;;  %v1916_v49 = vld [vmem:[#allocation16 + $0x1] ss:$0 sm:$0xff] }
 0x3b6   : > { %2021 = vmatpush3.bf16.msra.mxu0 %v2208_v48  ;;  %2022 = vmatprep.mubr.msk.bf16.mxu0 %vm2594_vm0, %v2593_v0 }
 0x3b7   : > { %2032 = vmatprep.subr.bf16.mxu0 %v2593_v0 }
 0x3bd   : > { %2023 = vmatmul.mubr.msk.bf16.vlgmr.msra.gmra.mxu0 %vm830_vm1, %v2969_v3 }
 0x3be   : > { %2034 = vmatprep.mubr.msk.bf16.mxu0 %vm2594_vm0, %v2593_v0 }
 0x475   : > { %v1129_v55 = vpop.f32.mrf.mxu0 }
 0x476   : > { %v1130_v26 = vadd.f32 %v1896_v25, %v1129_v55 }
 0x477   : > { %v2012_v56 = vpop.f32.mrf.mxu0 }
 0x478   : > { %v1190_v27 = vadd.f32 %v1185_v14, %v1130_v26 }
 0x479   : > { %v1132_v57 = vpop.f32.mrf.mxu0 }
 0x47a   : > { %v1903_v28 = vmul.f32 -1.442695, %v1190_v27 }
 0x47b   : > { %v2013_v58 = vpop.f32.mrf.mxu0 }
 0x47c   : > { %2215 = vpow2.f32 %v1903_v28 }
 0x47d   : > { %v1272_v60 = vpop.f32.mrf.mxu0 }
 0x47e   : > { %v1273_v62 = vadd.f32 %v1904_v59, %v1272_v60 }
 0x47f   : > { %v2024_v63 = vpop.f32.mrf.mxu0 }
 0x480   : > { %v1278_v1 = vpack.c.bf16 %v1273_v62, %v1273_v62 }
 0x481   : > { %v1275_v5 = vpop.f32.mrf.mxu0 }
 0x482   : > { %2029 = vmatmul.mubr.msk.bf16.vlgmr.msra.gmra.mxu1 %vm830_vm1, %v1278_v1 }
 0x483   : > { %v2025_v6 = vpop.f32.mrf.mxu0  ;;  %2039 = vmatpush3.bf16.msra.mxu1 %v1381_v4  ;;  %2040 = vmatprep.mubr.msk.bf16.mxu1 %vm2594_vm0, %v2593_v0 }
 0x484   : > { %2052 = vmatprep.subr.bf16.mxu1 %v2593_v0  ;;  %v2213_v6 = vld [vmem:[%s3240_s28 + $0x8] sm:$0xff]  }
 0x489   : > { %v2216_v29 = vpop.eup %2215 }
 0x48a   : > { %2041 = vmatmul.mubr.msk.bf16.vlgmr.msra.gmra.mxu1 %vm667_vm3, %v3007_v22  ;;  %v1194_v30 = vadd.f32 1.0, %v2216_v29 }
 0x48b   : > { %2053 = vmatpush3.bf16.msra.mxu1 %v2210_v7  ;;  %2054 = vmatprep.mubr.msk.bf16.mxu1 %vm2594_vm0, %v2593_v0 }
 0x48c   : > { %2217 = vrcp.f32 %v1194_v30 }
 0x492   : > { %2055 = vmatmul.mubr.msk.bf16.vlgmr.msra.gmra.mxu1 %vm830_vm1, %v2969_v3  ;;  %v1921_v3 = vld [vmem:[%s3168_s11 + $0x1] ss:$0 sm:$0xff] }
 0x499   : > { %v3071_v33 = vpop.eup %2217 }
 0x542   : > { %v1325_v9 = vpop.f32.mrf.mxu1 }
 0x543   : > { %v1331_v10 = vpack.c.bf16 %v1325_v9, %v1325_v9 }
 0x544   : > { %v2030_v12 = vpop.f32.mrf.mxu1 }
 0x545   : > { %1333 = vrot.lane.b32.xlu0 %v1331_v10, %s2595_s25  ;;  %v1208_v10 = vsub.f32 1.0, %v3071_v33 }
 0x546   : > { %v1328_v13 = vpop.f32.mrf.mxu1 }
 0x548   : > { %v2031_v15 = vpop.f32.mrf.mxu1 }
 0x549   : > { %1198 = vrot.lane.b32.xlu0 %v1185_v14, %s2595_s25 }
 0x54a   : > { %v1417_v16 = vpop.f32.mrf.mxu1 }
 0x54c   : > { %v2042_v17 = vpop.f32.mrf.mxu1 }
 0x54e   : > { %v1420_v18 = vpop.f32.mrf.mxu1 }
 0x550   : > { %v2043_v19 = vpop.f32.mrf.mxu1 }
 0x552   : > { %v1556_v20 = vpop.f32.mrf.mxu1 }
 0x553   : > { %v1557_v21 = vadd.f32 %v1921_v3, %v1556_v20 }
 0x554   : > { %v2056_v22 = vpop.f32.mrf.mxu1 }
 0x555   : > { %1570 = vrot.lane.b32.xlu0 %v1557_v21, %s2595_s25 }
 0x556   : > { %v1559_v23 = vpop.f32.mrf.mxu1 }
 0x557   : > { %v1925_v23 = vld [vmem:[%s3241_s5] ss:$0 sm:$0xff] }
 0x558   : > { %v2057_v24 = vpop.f32.mrf.mxu1 }
 0x559   : > { %v1601_v24 = vadd.f32 %v1925_v23, %v2965_v2 }
 0x5b7   : > { %v1334_v31 = vpop.permute.xlu0 %1333 }
 0x5b8   : > { %v1336_v32 = vsel %vm933_vm4, %v1334_v31, 0 }
 0x5b9   : > { %2033 = vmatpush3.bf16.msra.mxu0 %v1336_v32 }
 0x5ba   : > { %2044 = vmatprep.subr.bf16.mxu0 %v2593_v0 }
 0x5bb   : > { %v1199_v35 = vpop.permute.xlu0 %1198 }
 0x5bc   : > { %v1201_v8 = vmul.f32 %v3071_v33, %v1199_v35  ;;  %2035 = vmatmul.mubr.msk.bf16.vlgmr.msra.gmra.mxu0 %vm667_vm3, %v3017_v34  ;;  %v1911_v34 = vld [vmem:[#allocation14 + $0x1] ss:$0 sm:$0xff] }
 0x5bd   : > { %2048 = vmatprep.mubr.msk.bf16.mxu0 %vm2594_vm0, %v2593_v0  ;;  %2045 = vmatpush3.bf16.msra.mxu0 %v2211_v36  ;;  %v1431_v38 = vadd.f32 %v1911_v34, %v1325_v9  ;;  %v2214_v9 = vld [vmem:[%s3240_s28] sm:$0xff]  }
 0x5be   : > { %1203 = vrot.lane.b32.xlu0 %v1201_v8, %s2596_s26  ;;  %2046 = vmatprep.subr.bf16.mxu0 %v2593_v0 }
 0x5bf   : > { %v1432_v40 = vmul.f32 %v1431_v38, %v3037_v39 }
 0x5c1   : > { %2047 = vmatpush3.bf16.msra.mxu0 %v2212_v37 }
 0x5c2   : > { %2058 = vmatprep.subr.bf16.mxu0 %v2593_v0 }
 0x5c7   : > { %v1571_v56 = vpop.permute.xlu0 %1570 }
 0x630   : > { %v1204_v59 = vpop.permute.xlu0 %1203 }
 0x631   : > { %v1206_v60 = vadd.f32 %v1204_v59, %v1130_v26 }
 0x67c   : > { %v1372_v41 = vpop.f32.mrf.mxu0 }
 0x67d   : > { %v1433_v42 = vadd.f32 %v1432_v40, %v1372_v41 }
 0x67e   : > { %v2036_v44 = vpop.f32.mrf.mxu0 }
 0x67f   : > { %v1434_v43 = vadd.f32 %v1433_v42, %v1417_v16 }
 0x680   : > { %v1375_v45 = vpop.f32.mrf.mxu0 }
 0x681   : > { %v1435_v46 = vmax.f32 %v1434_v43, 0.0 }
 0x682   : > { %v2037_v47 = vpop.f32.mrf.mxu0 }
 0x683   : > { %v1436_v48 = vpack.c.bf16 %v1435_v46, %v1435_v46 }
 0x685   : > { %2049 = vmatmul.mubr.msk.bf16.vlgmr.msra.gmra.mxu0 %vm1091_vm12, %v1436_v48 }
 0x686   : > { %2062 = vmatprep.mubr.msk.bf16.mxu0 %vm2594_vm0, %v2593_v0  ;;  %2059 = vmatpush3.bf16.msra.mxu0 %v2213_v6 }
 0x687   : > { %2060 = vmatprep.subr.bf16.mxu0 %v2593_v0 }
 0x68a   : > { %2061 = vmatpush3.bf16.msra.mxu0 %v2214_v9 }
 0x745   : > { %v1499_v50 = vpop.f32.mrf.mxu0 }
 0x746   : > { %v1500_v51 = vadd.f32 %v1916_v49, %v1499_v50 }
 0x747   : > { %v2050_v52 = vpop.f32.mrf.mxu0 }
 0x748   : > { %v1562_v53 = vadd.f32 %v1557_v21, %v1500_v51 }
 0x749   : > { %v1502_v54 = vpop.f32.mrf.mxu0 }
 0x74a   : > { %v1924_v39 = vmul.f32 -1.442695, %v1562_v53 }
 0x74b   : > { %v2051_v55 = vpop.f32.mrf.mxu0 }
 0x74c   : > { %2219 = vpow2.f32 %v1924_v39 }
 0x759   : > { %v2220_v57 = vpop.eup %2219 }
 0x75a   : > { %v1566_v58 = vadd.f32 1.0, %v2220_v57 }
 0x75c   : > { %2221 = vrcp.f32 %v1566_v58 }
 0x75d   : > { %2223 = vtanh.f32 %v1206_v60 }
 0x769   : > { %v2222_v61 = vpop.eup %2221 }
 0x76a   : > { %v1573_v62 = vmul.f32 %v2222_v61, %v1571_v56  ;;  %v2224_v63 = vpop.eup %2223  ;;  %v1580_v16 = vsub.f32 1.0, %v2222_v61 }
 0x76c   : > { %1575 = vrot.lane.b32.xlu0 %v1573_v62, %s2596_s26 }
 0x770   : > { %1210 = vrot.lane.b32.xlu0 %v2224_v63, %s2597_s20 }
 0x774   : > { %1215 = vrot.lane.b32.xlu0 %v2965_v2, %s2598_s14 }
 0x7de   : > { %v1576_v1 = vpop.permute.xlu0 %1575 }
 0x7df   : > { %v1578_v4 = vadd.f32 %v1576_v1, %v1500_v51 }
 0x7e1   : > { %2225 = vtanh.f32 %v1578_v4 }
 0x7e2   : > { %v1211_v5 = vpop.permute.xlu0 %1210 }
 0x7e3   : > { %v1213_v12 = vmul.f32 %v1211_v5, %v1208_v10 }
 0x7e6   : > { %v1216_v7 = vpop.permute.xlu0 %1215 }
 0x7e7   : > { %v1218_v11 = vmul.f32 %v3071_v33, %v1216_v7  ;;  %v1586_v17 = vmul.f32 %v2222_v61, %v1216_v7 }
 0x7e9   : > { %v1219_v13 = vadd.f32 %v1218_v11, %v1213_v12 }
 0x7eb   : > { %v1220_v15 = vmax.f32 %v1219_v13, 0.0 }
 0x7ee   : > { %v2226_v14 = vpop.eup %2225 }
 0x7ef   : > { %1582 = vrot.lane.b32.xlu0 %v2226_v14, %s2597_s20 }
 0x7f3   : > { %1590 = vrot.lane.b32.xlu0 %v1220_v15, %s2597_s20  ;;  %s2497_s20 = sshll.u32 %s2599_s4, 4  ;;  %s2498_s20 = int_to_ptr.vmem [resolvable:$false] %s2497_s20 }
 0x7f4   : > { %s2499_s14 = scalar_lea.vmem %s2498_s20, 256  ;;  %p2500_p1 = scmp.lt.s32.totalorder %s3115_s21, %s2498_s20 }
 0x7f5   : > { %p2501_p11 = scmp.lt.s32.totalorder %s2499_s14, %s2493_s19 }
 0x7f7   : > { %p2502_p12 = por %p2501_p11, %p2500_p1 }
 0x7f9   : > { %p2503_p6 = pnand %p2502_p12, %p2496_p13 }
 0x861   : > { %v1583_v0 = vpop.permute.xlu0 %1582 }
 0x862   : > { %v1585_v18 = vmul.f32 %v1583_v0, %v1580_v16 }
 0x864   : > { %v1587_v19 = vadd.f32 %v1586_v17, %v1585_v18 }
 0x865   : > { %v1591_v20 = vpop.permute.xlu0 %1590 }
 0x866   : > { %v1588_v3 = vmax.f32 %v1587_v19, 0.0 }
 0x868   : > { %v1593_v21 = vsel %vm830_vm1, %v1591_v20, %v1588_v3 }
 0x869   : > { %v1602_v22 = vpack.c.bf16 %v1593_v21, %v1593_v21 }
 0x86b   : > { %2063 = vmatmul.mubr.msk.bf16.vlgmr.msra.gmra.mxu0 %vm1091_vm12, %v1602_v22 }
 0x92b   : > { %v1656_v25 = vpop.f32.mrf.mxu0 }
 0x92c   : > { %v1662_v26 = vadd.f32 %v1656_v25, %v1601_v24 }
 0x92d   : > { %v2064_v27 = vpop.f32.mrf.mxu0 }
 0x92e   : > { %1663 = vst.msk [vmem:[%s658_s23] sm:$0xff] %vm830_vm1, %v1662_v26 }
 0x92f   : > { %v1659_v28 = vpop.f32.mrf.mxu0 }
 0x930   : > { %2506 = shalt.err (!%p2503_p6)
}
 0x931   : > { %s2507_s27 = scalar_lea.hbm %s3113_s1, 128  ;;  %s2511_s25 = scalar_lea.hbm %s3243_s24, 256 }
 0x932   : > { %p2508_p7 = scmp.ne.s32.totalorder %s3113_s1, %s2507_s27  ;;  %p2512_p0 = scmp.lt.s32.totalorder %s3113_s1, %s3243_s24 }
 0x933   : > { %p2513_p2 = scmp.lt.s32.totalorder %s2511_s25, %s2507_s27 }
 0x934   : > { %p2509_p9 = pnand %p2508_p7, %p3244_p5 }
 0x935   : > { %p2514_p10 = por %p2513_p2, %p2512_p0 }
 0x936   : > { %p2510_p8 = pneg %p2509_p9 }
 0x938   : > { %p2515_p3 = pnand %p2514_p10, %p2510_p8 }
 0x93a   : > { %2518 = shalt.err (!%p2515_p3)
}
 0x93b   : > { %2100 = dma.vmem_to_hbm [thread:$0]  (%p3244_p5), %s3115_s21, 128, %s3113_s1, %s1665_s17   ;;  %v2065_v2 = vpop.f32.mrf.mxu0 }
 0x93c PF: > { %s3245_s3 = sld [smem:[#allocation27_spill]]  ;;  %p3248_p13 = scmp.ge.s32.totalorder %s2577_s16, 2 }
 0x93d   : > { %s3246_s5 = sld [smem:[#allocation32_spill]] }
 0x942   : > { %s1690_s18 = sand.u32 1, %s3245_s3  }
 0x943   : > { %p3247_p4 = scmp.ne.s32.totalorder %s3246_s5, 0  ;;  %s1691_s23 = scalar_lea.sflag [#allocation4], %s1690_s18 }
 0x945   : > { %p2135_p1 = pnand %p3248_p13, %p3247_p4 }
 0x947   : > { %p2136_p11 = pneg %p2135_p1 }
 0x949   : > { %2560 = dma.done.wait (%p2136_p11), %s1691_s23, 128  }
 0x94a   : > { %2562 = vsyncadd (%p2136_p11), %s1691_s23, 4294967168  ;;  %s3249_s16 = sld [smem:[#allocation29_spill]]  ;;  %s3252_s29 = smov %s2569_s30 }
 0x94b   : > { %s3250_s26 = sld [smem:[#allocation28_spill]] }
 0x94c   : > { %s3251_s15 = sld [smem:[#allocation30_spill]] }
 0x950   : > { %p34_p12 = scmp.ge.s32.totalorder %s3249_s16, 4  }
 0x951   : > { %s3253_s30 = smov %s3250_s26 }
 0x952   :  { %36 = sbr.rel (!%p34_p12) target bundleno = 20 (0x14), region = 182 }
 0x957   :  { %1696 = vsyncpa [#allocation3], 1 }
 0x958   :  { %1698 = vsyncpa [#allocation3 + $0x1], 1 }
 0x959   :  { %1699 = vsyncpa [#allocation6], 1 }
 0x95a   :  { %1701 = vsyncpa [#allocation6 + $0x1], 1 }
 0x95b   :  { %1702 = vsyncpa [#allocation9], 1 }
 0x95c   :  { %1703 = vsyncpa [#allocation12], 1 }
 0x95d   :  { %1704 = vsyncpa [#allocation15], 1 }
 0x95e   :  { %1705 = vsyncpa [#allocation18], 1 }
 0x95f   :  { %1706 = vsyncpa [#allocation4], 1 }
 0x960   :  { %1708 = vsyncpa [#allocation4 + $0x1], 1 }

</bundles_post_ra>
